<compile_context>
chip_gen: v5e
topology: v5e:2x2
jax: 0.10.0
libtpu: 0.0.40
codegen_flags: <defaults>
</compile_context>

<pallas_src>
import math

import jax
import jax.numpy as jnp
from jax.experimental import pallas as pl
from jax.experimental.pallas import tpu as pltpu

# ---- model hyper-parameters (small, consistent with the module's constructor) ----
DIM = 32        # token feature dim
DEPTH = 2       # number of transformer layers
HEADS = 4       # attention heads
MLP_DIM = 64    # feed-forward hidden dim
SEQ = 8         # sequence length
BATCH = 2       # batch size
HEAD_DIM = DIM // HEADS
LN_EPS = 1e-5
_SQRT2 = math.sqrt(2.0)
_NEG_BIG = -1e30

# slab geometry (static)
_LAYER_ROWS = DIM + MLP_DIM                     # 96 rows per layer block
_W_ROWS = DEPTH * _LAYER_ROWS + DIM             # 224
_B_ROWS = 8                                     # 2*DEPTH + 1 used, padded to 8 sublanes
_SLAB_COLS = 4 * DIM                            # 128 (lane-dense)


# ----------------- small math helpers (used inside the kernel) -----------------
def _layernorm(x, g, b):
    # two-pass variance, matching torch.nn.LayerNorm
    mean = jnp.mean(x, axis=-1, keepdims=True)
    c = x - mean
    var = jnp.mean(c * c, axis=-1, keepdims=True)
    return c * jax.lax.rsqrt(var + LN_EPS) * g + b


def _softmax(x):
    m = jnp.max(x, axis=-1, keepdims=True)
    e = jnp.exp(x - m)
    s = jnp.sum(e, axis=-1, keepdims=True)
    return e * pl.reciprocal(s, approx=True)


def _gelu_exact(x):
    # matches torch.nn.GELU() (erf form)
    return 0.5 * x * (1.0 + jax.lax.erf(x / _SQRT2))


def _softplus(x):
    # matches F.softplus(x, beta=1, threshold=20)
    safe = jnp.minimum(x, 20.0)
    return jnp.where(x > 20.0, x, jnp.log1p(jnp.exp(safe)))


def _bf16(x):
    return x.astype(jnp.bfloat16)


# --------------------------------- kernel ---------------------------------
def transformer_ib_kernel(data_ref, mask_ref, w_ref, b_ref, out_ref):
    # data_ref : (GT, 2*DIM)  f32   -- [x | eps] for this batch group
    # mask_ref : (GT, GT)     f32   -- additive attention bias (0 / -1e30), block-diagonal per batch
    # w_ref    : (224, 128)   bf16  -- packed weight slab
    # b_ref    : (8, 128)     f32   -- packed bias / LayerNorm slab
    # out_ref  : (GT, 4*DIM)  f32   -- packed [z | rec | mu | std]
    x = data_ref[:, 0:DIM].astype(jnp.float32)
    eps = data_ref[:, DIM:2 * DIM].astype(jnp.float32)
    mask = mask_ref[...]

    for l in range(DEPTH):
        a0 = l * _LAYER_ROWS
        br = 2 * l
        ln1g = b_ref[br:br + 1, 0:DIM]
        ln1b = b_ref[br:br + 1, DIM:2 * DIM]
        bo = b_ref[br:br + 1, 2 * DIM:3 * DIM]
        ln2g = b_ref[br:br + 1, 3 * DIM:4 * DIM]
        ln2b = b_ref[br + 1:br + 2, 0:DIM]
        b1 = b_ref[br + 1:br + 2, DIM:DIM + MLP_DIM]
        b2 = b_ref[br + 1:br + 2, DIM + MLP_DIM:2 * DIM + MLP_DIM]

        # ---- Residual(PreNorm(Attention)) ----
        h = _layernorm(x, ln1g, ln1b)
        wqkv = w_ref[a0:a0 + DIM, 0:3 * DIM]            # (32, 96) bf16, scale folded into Q cols
        wo = w_ref[a0:a0 + DIM, 3 * DIM:4 * DIM]        # (32, 32) bf16
        qkv = jnp.dot(_bf16(h), wqkv, preferred_element_type=jnp.float32)   # (GT, 96) f32

        q = _bf16(qkv[:, 0:DIM])                        # (GT, 32)
        k = _bf16(qkv[:, DIM:2 * DIM])                  # (GT, 32)
        v = _bf16(qkv[:, 2 * DIM:3 * DIM])              # (GT, 32)

        heads_out = []
        for hh in range(HEADS):                         # unrolled: independent MXU work per head
            c0 = hh * HEAD_DIM
            # q_h @ k_h^T (contraction on last dim of both) -- canonical flash pattern,
            # keeps K stationary for the MXU, no per-head XLU transpose of K.
            dots = jax.lax.dot_general(
                q[:, c0:c0 + HEAD_DIM], k[:, c0:c0 + HEAD_DIM],
                (((1,), (1,)), ((), ())),
                preferred_element_type=jnp.float32)     # (GT, GT)
            attn = _softmax(dots + mask)
            heads_out.append(jnp.dot(_bf16(attn), v[:, c0:c0 + HEAD_DIM],
                                     preferred_element_type=jnp.float32))   # (GT, HEAD_DIM)

        o = jnp.concatenate(heads_out, axis=-1)         # (GT, 32)
        x = x + jnp.dot(_bf16(o), wo, preferred_element_type=jnp.float32) + bo

        # ---- Residual(PreNorm(FeedForward)) ----
        h = _layernorm(x, ln2g, ln2b)
        w1 = w_ref[a0 + DIM:a0 + 2 * DIM, 0:MLP_DIM]                # (32, 64) bf16
        w2 = w_ref[a0 + DIM:a0 + DIM + MLP_DIM, MLP_DIM:MLP_DIM + DIM]  # (64, 32) bf16
        mid = jnp.dot(_bf16(h), w1, preferred_element_type=jnp.float32) + b1
        mid = _gelu_exact(mid)
        x = x + jnp.dot(_bf16(mid), w2, preferred_element_type=jnp.float32) + b2

    # ---- InformationBottleneck ----
    ib0 = DEPTH * _LAYER_ROWS
    ibr = 2 * DEPTH
    encw = w_ref[ib0:ib0 + DIM, 0:DIM]                  # (32, 32)
    mustdw = w_ref[ib0:ib0 + DIM, DIM:3 * DIM]          # (32, 64) = [muW | stdW] fused
    decw = w_ref[ib0:ib0 + DIM, 3 * DIM:4 * DIM]        # (32, 32)
    encb = b_ref[ibr:ibr + 1, 0:DIM]
    mustdb = b_ref[ibr:ibr + 1, DIM:3 * DIM]
    decb = b_ref[ibr:ibr + 1, 3 * DIM:4 * DIM]

    e = jnp.dot(_bf16(x), encw, preferred_element_type=jnp.float32) + encb
    e = jnp.maximum(e, 0.0)
    mustd = jnp.dot(_bf16(e), mustdw, preferred_element_type=jnp.float32) + mustdb
    mu = mustd[:, 0:DIM]
    std = _softplus(mustd[:, DIM:2 * DIM] - 5.0)
    z = mu + eps * std
    rec = jnp.dot(_bf16(z), decw, preferred_element_type=jnp.float32) + decb

    # one lane-dense (GT, 128) packed store: z | rec | mu | std
    out_ref[...] = jnp.concatenate([z, rec, mu, std], axis=-1).astype(out_ref.dtype)


# --------------------------- host-side slab packing ---------------------------
def _build_slabs(params):
    (ln1g, ln1b, wqkv, wo, bo, ln2g, ln2b, w1, b1, w2, b2,
     encw, encb, muw, mub, stdw, stdb, decw, decb) = params
    scale = DIM ** (-0.5)  # full-dim scaling, matching the torch module; folded into Q weights
    wqkv_s = wqkv.at[:, :, :DIM].multiply(scale)

    wblocks = []
    for l in range(DEPTH):
        block_a = jnp.concatenate([wqkv_s[l], wo[l]], axis=1)                       # (32, 128)
        w1_pad = jnp.concatenate(
            [w1[l], jnp.zeros((MLP_DIM - DIM, MLP_DIM), jnp.float32)], axis=0)      # (64, 64)
        block_b = jnp.concatenate(
            [w1_pad, w2[l], jnp.zeros((MLP_DIM, DIM), jnp.float32)], axis=1)        # (64, 128)
        wblocks += [block_a, block_b]
    wblocks.append(jnp.concatenate([encw, muw, stdw, decw], axis=1))                # (32, 128)
    wslab = jnp.concatenate(wblocks, axis=0).astype(jnp.bfloat16)                   # (224, 128)

    brows = []
    for l in range(DEPTH):
        brows.append(jnp.concatenate([ln1g[l, 0], ln1b[l, 0], bo[l, 0], ln2g[l, 0]]))
        brows.append(jnp.concatenate([ln2b[l, 0], b1[l, 0], b2[l, 0]]))
    brows.append(jnp.concatenate([encb[0], mub[0], stdb[0], decb[0]]))
    bslab = jnp.stack(brows)                                                        # (5, 128)
    bslab = jnp.concatenate(
        [bslab, jnp.zeros((_B_ROWS - bslab.shape[0], _SLAB_COLS), jnp.float32)], axis=0)
    return wslab, bslab


# --------------------------------- wrapper ---------------------------------
def transformer_ib_forward(x, eps, params):
    B, N, D = x.shape
    T = B * N

    # Batch groups -> leading "parallel" grid axis (v7x uses both TensorCores; harmless elsewhere).
    num_groups = 2 if (B % 2 == 0 and B >= 2) else 1
    group_b = B // num_groups
    GT = group_b * N  # tokens per group

    wslab, bslab = _build_slabs(params)

    # packed activation slab and additive block-diagonal attention bias (per group, grid-constant)
    data = jnp.concatenate([x.reshape(T, D), eps.reshape(T, D)], axis=-1)           # (T, 64)
    row_b = jnp.arange(GT) // N
    maskbias = jnp.where(row_b[:, None] == row_b[None, :], 0.0, _NEG_BIG).astype(jnp.float32)

    packed = pl.pallas_call(
        transformer_ib_kernel,
        out_shape=jax.ShapeDtypeStruct((T, 4 * D), jnp.float32),
        grid=(num_groups,),
        in_specs=[
            pl.BlockSpec((GT, 2 * D), lambda g: (g, 0)),
            pl.BlockSpec((GT, GT), lambda g: (0, 0)),
            pl.BlockSpec((_W_ROWS, _SLAB_COLS), lambda g: (0, 0)),
            pl.BlockSpec((_B_ROWS, _SLAB_COLS), lambda g: (0, 0)),
        ],
        out_specs=pl.BlockSpec((GT, 4 * D), lambda g: (g, 0)),
        compiler_params=pltpu.CompilerParams(dimension_semantics=("parallel",)),
    )(data, maskbias, wslab, bslab)

    packed = packed.reshape(B, N, 4 * D)
    z = packed[..., 0 * D:1 * D]
    rec = packed[..., 1 * D:2 * D]
    mu = packed[..., 2 * D:3 * D]
    std = packed[..., 3 * D:4 * D]
    return z, rec, mu, std


transformer_ib_forward = jax.jit(transformer_ib_forward)


# ------------------------- deterministic parameter init -------------------------
def init_params(key):
    keys = jax.random.split(key, 24)
    it = iter(keys)

    def w(shape, scale=0.05):
        return jax.random.normal(next(it), shape, jnp.float32) * scale

    ln1g = jnp.ones((DEPTH, 1, DIM), jnp.float32)
    ln1b = jnp.zeros((DEPTH, 1, DIM), jnp.float32)
    wqkv = w((DEPTH, DIM, 3 * DIM))
    wo = w((DEPTH, DIM, DIM))
    bo = w((DEPTH, 1, DIM))
    ln2g = jnp.ones((DEPTH, 1, DIM), jnp.float32)
    ln2b = jnp.zeros((DEPTH, 1, DIM), jnp.float32)
    w1 = w((DEPTH, DIM, MLP_DIM))
    b1 = w((DEPTH, 1, MLP_DIM))
    w2 = w((DEPTH, MLP_DIM, DIM))
    b2 = w((DEPTH, 1, DIM))
    encw = w((DIM, DIM)); encb = w((1, DIM))
    muw = w((DIM, DIM)); mub = w((1, DIM))
    stdw = w((DIM, DIM)); stdb = w((1, DIM))
    decw = w((DIM, DIM)); decb = w((1, DIM))
    return [ln1g, ln1b, wqkv, wo, bo, ln2g, ln2b, w1, b1, w2, b2,
            encw, encb, muw, mub, stdw, stdb, decw, decb]


# ----------------------------- pure-JAX f32 reference -----------------------------
def reference_forward(x, eps, params):
    (ln1g, ln1b, wqkv, wo, bo, ln2g, ln2b, w1, b1, w2, b2,
     encw, encb, muw, mub, stdw, stdb, decw, decb) = params

    def ln(v, g, b):
        m = jnp.mean(v, -1, keepdims=True)
        var = jnp.mean((v - m) ** 2, -1, keepdims=True)
        return (v - m) / jnp.sqrt(var + LN_EPS) * g + b

    scale = DIM ** (-0.5)
    B, N, D = x.shape
    for l in range(DEPTH):
        h = ln(x, ln1g[l], ln1b[l])
        qkv = jnp.einsum('bnd,de->bne', h, wqkv[l])
        q, k, v = jnp.split(qkv, 3, axis=-1)
        to_heads = lambda t: t.reshape(B, N, HEADS, HEAD_DIM).transpose(0, 2, 1, 3)
        qh, kh, vh = to_heads(q), to_heads(k), to_heads(v)
        dots = jnp.einsum('bhid,bhjd->bhij', qh, kh) * scale
        attn = jax.nn.softmax(dots, axis=-1)
        o = jnp.einsum('bhij,bhjd->bhid', attn, vh)
        o = o.transpose(0, 2, 1, 3).reshape(B, N, D)
        o = jnp.einsum('bnd,de->bne', o, wo[l]) + bo[l]
        x = x + o

        h = ln(x, ln2g[l], ln2b[l])
        mid = jnp.einsum('bnd,dm->bnm', h, w1[l]) + b1[l]
        mid = 0.5 * mid * (1.0 + jax.lax.erf(mid / _SQRT2))
        o = jnp.einsum('bnm,md->bnd', mid, w2[l]) + b2[l]
        x = x + o

    e = jnp.maximum(x @ encw + encb, 0.0)
    mu = e @ muw + mub
    std = _softplus(e @ stdw + stdb - 5.0)
    z = mu + eps * std
    rec = z @ decw + decb
    return z, rec, mu, std


# --------------------------------- main ---------------------------------
if __name__ == "__main__":
    import numpy as np

    key = jax.random.PRNGKey(0)
    kx, keps, kp = jax.random.split(key, 3)
    x = jax.random.normal(kx, (BATCH, SEQ, DIM), jnp.float32)
    # deterministic stand-in for torch.randn_like in reparameterize()
    eps = jax.random.normal(keps, (BATCH, SEQ, DIM), jnp.float32)
    params = init_params(kp)

    z, rec, mu, std = transformer_ib_forward(x, eps, params)
    jax.block_until_ready((z, rec, mu, std))

    zr, recr, mur, stdr = reference_forward(x, eps, params)
    # Tolerances account for single-pass bf16 MXU matmuls (native MXU precision) vs f32 reference;
    # std sits behind softplus(~-5) so its error is orders of magnitude smaller.
    tols = {"z": 1e-2, "rec": 1e-2, "mu": 1e-2, "std": 1e-3}
    for name, got, want in (("z", z, zr), ("rec", rec, recr), ("mu", mu, mur), ("std", std, stdr)):
        diff = np.max(np.abs(np.asarray(got) - np.asarray(want)))
        assert diff < tols[name], f"{name} mismatch vs reference: {diff}"

    print("KERNEL_OK")
</pallas_src>

<mosaic_0001>
module attributes {stable_mosaic.version = 11 : i64} {
  func.func @transformer_ib_kernel(%arg0: i32, %arg1: memref<8x64xf32, #tpu.memory_space<vmem>>, %arg2: memref<8x8xf32, #tpu.memory_space<vmem>>, %arg3: memref<224x128xbf16, #tpu.memory_space<vmem>>, %arg4: memref<8x128xf32, #tpu.memory_space<vmem>>, %arg5: memref<8x128xf32, #tpu.memory_space<vmem>>) attributes {dimension_semantics = [#tpu.dimension_semantics<parallel>], iteration_bounds = array<i64: 2>, scalar_prefetch = 0 : i64, scratch_operands = 0 : i64, tpu.core_type = #tpu.core_type<tc>, window_params = [{transform_indices = @transform_0, window_bounds = array<i64: 8, 64>}, {pipeline_mode = #tpu.pipeline_mode<synchronous>, transform_indices = @transform_1, window_bounds = array<i64: 8, 8>}, {pipeline_mode = #tpu.pipeline_mode<synchronous>, transform_indices = @transform_2, window_bounds = array<i64: 224, 128>}, {pipeline_mode = #tpu.pipeline_mode<synchronous>, transform_indices = @transform_3, window_bounds = array<i64: 8, 128>}, {transform_indices = @transform_4, window_bounds = array<i64: 8, 128>}]} {
    %c0 = arith.constant 0 : index
    %c0_0 = arith.constant 0 : index
    %0 = vector.load %arg1[%c0, %c0_0] : memref<8x64xf32, #tpu.memory_space<vmem>>, vector<8x32xf32>
    %c0_1 = arith.constant 0 : index
    %c32 = arith.constant 32 : index
    %1 = vector.load %arg1[%c0_1, %c32] : memref<8x64xf32, #tpu.memory_space<vmem>>, vector<8x32xf32>
    %c0_2 = arith.constant 0 : index
    %c0_3 = arith.constant 0 : index
    %2 = vector.load %arg2[%c0_2, %c0_3] : memref<8x8xf32, #tpu.memory_space<vmem>>, vector<8x8xf32>
    %c0_4 = arith.constant 0 : index
    %c0_5 = arith.constant 0 : index
    %3 = vector.load %arg4[%c0_4, %c0_5] : memref<8x128xf32, #tpu.memory_space<vmem>>, vector<1x32xf32>
    %c0_6 = arith.constant 0 : index
    %c32_7 = arith.constant 32 : index
    %4 = vector.load %arg4[%c0_6, %c32_7] : memref<8x128xf32, #tpu.memory_space<vmem>>, vector<1x32xf32>
    %c0_8 = arith.constant 0 : index
    %c64 = arith.constant 64 : index
    %5 = vector.load %arg4[%c0_8, %c64] : memref<8x128xf32, #tpu.memory_space<vmem>>, vector<1x32xf32>
    %c0_9 = arith.constant 0 : index
    %c96 = arith.constant 96 : index
    %6 = vector.load %arg4[%c0_9, %c96] : memref<8x128xf32, #tpu.memory_space<vmem>>, vector<1x32xf32>
    %c1 = arith.constant 1 : index
    %c0_10 = arith.constant 0 : index
    %7 = vector.load %arg4[%c1, %c0_10] : memref<8x128xf32, #tpu.memory_space<vmem>>, vector<1x32xf32>
    %c1_11 = arith.constant 1 : index
    %c32_12 = arith.constant 32 : index
    %8 = vector.load %arg4[%c1_11, %c32_12] : memref<8x128xf32, #tpu.memory_space<vmem>>, vector<1x64xf32>
    %c1_13 = arith.constant 1 : index
    %c96_14 = arith.constant 96 : index
    %9 = vector.load %arg4[%c1_13, %c96_14] : memref<8x128xf32, #tpu.memory_space<vmem>>, vector<1x32xf32>
    %cst = arith.constant dense<0.000000e+00> : vector<8xf32>
    %10 = vector.multi_reduction <add>, %0, %cst [1] : vector<8x32xf32> to vector<8xf32>
    %11 = vector.shape_cast %10 : vector<8xf32> to vector<8x1xf32>
    %cst_15 = arith.constant 3.200000e+01 : f32
    %12 = vector.broadcast %cst_15 : f32 to vector<8x1xf32>
    %13 = arith.divf %11, %12 : vector<8x1xf32>
    %14 = vector.broadcast %13 : vector<8x1xf32> to vector<8x32xf32>
    %15 = arith.subf %0, %14 : vector<8x32xf32>
    %16 = arith.mulf %15, %15 : vector<8x32xf32>
    %cst_16 = arith.constant dense<0.000000e+00> : vector<8xf32>
    %17 = vector.multi_reduction <add>, %16, %cst_16 [1] : vector<8x32xf32> to vector<8xf32>
    %18 = vector.shape_cast %17 : vector<8xf32> to vector<8x1xf32>
    %cst_17 = arith.constant 3.200000e+01 : f32
    %19 = vector.broadcast %cst_17 : f32 to vector<8x1xf32>
    %20 = arith.divf %18, %19 : vector<8x1xf32>
    %cst_18 = arith.constant 9.99999974E-6 : f32
    %21 = vector.broadcast %cst_18 : f32 to vector<8x1xf32>
    %22 = arith.addf %20, %21 : vector<8x1xf32>
    %23 = math.rsqrt %22 : vector<8x1xf32>
    %24 = vector.broadcast %23 : vector<8x1xf32> to vector<8x32xf32>
    %25 = arith.mulf %15, %24 : vector<8x32xf32>
    %26 = vector.broadcast %3 : vector<1x32xf32> to vector<8x32xf32>
    %27 = arith.mulf %25, %26 : vector<8x32xf32>
    %28 = vector.broadcast %4 : vector<1x32xf32> to vector<8x32xf32>
    %29 = arith.addf %27, %28 : vector<8x32xf32>
    %c0_19 = arith.constant 0 : index
    %c0_20 = arith.constant 0 : index
    %30 = vector.load %arg3[%c0_19, %c0_20] : memref<224x128xbf16, #tpu.memory_space<vmem>>, vector<32x96xbf16>
    %c0_21 = arith.constant 0 : index
    %c96_22 = arith.constant 96 : index
    %31 = vector.load %arg3[%c0_21, %c96_22] : memref<224x128xbf16, #tpu.memory_space<vmem>>, vector<32x32xbf16>
    %32 = arith.truncf %29 : vector<8x32xf32> to vector<8x32xbf16>
    %cst_23 = arith.constant dense<0.000000e+00> : vector<8x96xf32>
    %33 = tpu.matmul %32, %30, %cst_23 {dimension_numbers = #tpu.dot_dimension_numbers<[1], [0], [0], [1], [0, 0, 1, 1], [], []>} : vector<8x32xbf16>, vector<32x96xbf16>, vector<8x96xf32> -> vector<8x96xf32>
    %34 = vector.extract_strided_slice %33 {offsets = [0, 0], sizes = [8, 32], strides = [1, 1]} : vector<8x96xf32> to vector<8x32xf32>
    %35 = arith.truncf %34 : vector<8x32xf32> to vector<8x32xbf16>
    %36 = vector.extract_strided_slice %33 {offsets = [0, 32], sizes = [8, 32], strides = [1, 1]} : vector<8x96xf32> to vector<8x32xf32>
    %37 = arith.truncf %36 : vector<8x32xf32> to vector<8x32xbf16>
    %38 = vector.extract_strided_slice %33 {offsets = [0, 64], sizes = [8, 32], strides = [1, 1]} : vector<8x96xf32> to vector<8x32xf32>
    %39 = arith.truncf %38 : vector<8x32xf32> to vector<8x32xbf16>
    %40 = vector.extract_strided_slice %35 {offsets = [0, 0], sizes = [8, 8], strides = [1, 1]} : vector<8x32xbf16> to vector<8x8xbf16>
    %41 = vector.extract_strided_slice %37 {offsets = [0, 0], sizes = [8, 8], strides = [1, 1]} : vector<8x32xbf16> to vector<8x8xbf16>
    %cst_24 = arith.constant dense<0.000000e+00> : vector<8x8xf32>
    %42 = tpu.matmul %40, %41, %cst_24 {dimension_numbers = #tpu.dot_dimension_numbers<[1], [1], [0], [0], [0, 0, 1, 0], [], []>} : vector<8x8xbf16>, vector<8x8xbf16>, vector<8x8xf32> -> vector<8x8xf32>
    %43 = arith.addf %42, %2 : vector<8x8xf32>
    %cst_25 = arith.constant dense<0xFF800000> : vector<8xf32>
    %44 = vector.multi_reduction <maximumf>, %43, %cst_25 [1] : vector<8x8xf32> to vector<8xf32>
    %45 = vector.shape_cast %44 : vector<8xf32> to vector<8x1xf32>
    %46 = vector.broadcast %45 : vector<8x1xf32> to vector<8x8xf32>
    %47 = arith.subf %43, %46 : vector<8x8xf32>
    %48 = math.exp %47 : vector<8x8xf32>
    %cst_26 = arith.constant dense<0.000000e+00> : vector<8xf32>
    %49 = vector.multi_reduction <add>, %48, %cst_26 [1] : vector<8x8xf32> to vector<8xf32>
    %50 = vector.shape_cast %49 : vector<8xf32> to vector<8x1xf32>
    %51 = tpu.reciprocal %50 {approx = true} : vector<8x1xf32> -> vector<8x1xf32>
    %52 = vector.broadcast %51 : vector<8x1xf32> to vector<8x8xf32>
    %53 = arith.mulf %48, %52 : vector<8x8xf32>
    %54 = arith.truncf %53 : vector<8x8xf32> to vector<8x8xbf16>
    %55 = vector.extract_strided_slice %39 {offsets = [0, 0], sizes = [8, 8], strides = [1, 1]} : vector<8x32xbf16> to vector<8x8xbf16>
    %cst_27 = arith.constant dense<0.000000e+00> : vector<8x8xf32>
    %56 = tpu.matmul %54, %55, %cst_27 {dimension_numbers = #tpu.dot_dimension_numbers<[1], [0], [0], [1], [0, 0, 1, 1], [], []>} : vector<8x8xbf16>, vector<8x8xbf16>, vector<8x8xf32> -> vector<8x8xf32>
    %57 = vector.extract_strided_slice %35 {offsets = [0, 8], sizes = [8, 8], strides = [1, 1]} : vector<8x32xbf16> to vector<8x8xbf16>
    %58 = vector.extract_strided_slice %37 {offsets = [0, 8], sizes = [8, 8], strides = [1, 1]} : vector<8x32xbf16> to vector<8x8xbf16>
    %cst_28 = arith.constant dense<0.000000e+00> : vector<8x8xf32>
    %59 = tpu.matmul %57, %58, %cst_28 {dimension_numbers = #tpu.dot_dimension_numbers<[1], [1], [0], [0], [0, 0, 1, 0], [], []>} : vector<8x8xbf16>, vector<8x8xbf16>, vector<8x8xf32> -> vector<8x8xf32>
    %60 = arith.addf %59, %2 : vector<8x8xf32>
    %cst_29 = arith.constant dense<0xFF800000> : vector<8xf32>
    %61 = vector.multi_reduction <maximumf>, %60, %cst_29 [1] : vector<8x8xf32> to vector<8xf32>
    %62 = vector.shape_cast %61 : vector<8xf32> to vector<8x1xf32>
    %63 = vector.broadcast %62 : vector<8x1xf32> to vector<8x8xf32>
    %64 = arith.subf %60, %63 : vector<8x8xf32>
    %65 = math.exp %64 : vector<8x8xf32>
    %cst_30 = arith.constant dense<0.000000e+00> : vector<8xf32>
    %66 = vector.multi_reduction <add>, %65, %cst_30 [1] : vector<8x8xf32> to vector<8xf32>
    %67 = vector.shape_cast %66 : vector<8xf32> to vector<8x1xf32>
    %68 = tpu.reciprocal %67 {approx = true} : vector<8x1xf32> -> vector<8x1xf32>
    %69 = vector.broadcast %68 : vector<8x1xf32> to vector<8x8xf32>
    %70 = arith.mulf %65, %69 : vector<8x8xf32>
    %71 = arith.truncf %70 : vector<8x8xf32> to vector<8x8xbf16>
    %72 = vector.extract_strided_slice %39 {offsets = [0, 8], sizes = [8, 8], strides = [1, 1]} : vector<8x32xbf16> to vector<8x8xbf16>
    %cst_31 = arith.constant dense<0.000000e+00> : vector<8x8xf32>
    %73 = tpu.matmul %71, %72, %cst_31 {dimension_numbers = #tpu.dot_dimension_numbers<[1], [0], [0], [1], [0, 0, 1, 1], [], []>} : vector<8x8xbf16>, vector<8x8xbf16>, vector<8x8xf32> -> vector<8x8xf32>
    %74 = vector.extract_strided_slice %35 {offsets = [0, 16], sizes = [8, 8], strides = [1, 1]} : vector<8x32xbf16> to vector<8x8xbf16>
    %75 = vector.extract_strided_slice %37 {offsets = [0, 16], sizes = [8, 8], strides = [1, 1]} : vector<8x32xbf16> to vector<8x8xbf16>
    %cst_32 = arith.constant dense<0.000000e+00> : vector<8x8xf32>
    %76 = tpu.matmul %74, %75, %cst_32 {dimension_numbers = #tpu.dot_dimension_numbers<[1], [1], [0], [0], [0, 0, 1, 0], [], []>} : vector<8x8xbf16>, vector<8x8xbf16>, vector<8x8xf32> -> vector<8x8xf32>
    %77 = arith.addf %76, %2 : vector<8x8xf32>
    %cst_33 = arith.constant dense<0xFF800000> : vector<8xf32>
    %78 = vector.multi_reduction <maximumf>, %77, %cst_33 [1] : vector<8x8xf32> to vector<8xf32>
    %79 = vector.shape_cast %78 : vector<8xf32> to vector<8x1xf32>
    %80 = vector.broadcast %79 : vector<8x1xf32> to vector<8x8xf32>
    %81 = arith.subf %77, %80 : vector<8x8xf32>
    %82 = math.exp %81 : vector<8x8xf32>
    %cst_34 = arith.constant dense<0.000000e+00> : vector<8xf32>
    %83 = vector.multi_reduction <add>, %82, %cst_34 [1] : vector<8x8xf32> to vector<8xf32>
    %84 = vector.shape_cast %83 : vector<8xf32> to vector<8x1xf32>
    %85 = tpu.reciprocal %84 {approx = true} : vector<8x1xf32> -> vector<8x1xf32>
    %86 = vector.broadcast %85 : vector<8x1xf32> to vector<8x8xf32>
    %87 = arith.mulf %82, %86 : vector<8x8xf32>
    %88 = arith.truncf %87 : vector<8x8xf32> to vector<8x8xbf16>
    %89 = vector.extract_strided_slice %39 {offsets = [0, 16], sizes = [8, 8], strides = [1, 1]} : vector<8x32xbf16> to vector<8x8xbf16>
    %cst_35 = arith.constant dense<0.000000e+00> : vector<8x8xf32>
    %90 = tpu.matmul %88, %89, %cst_35 {dimension_numbers = #tpu.dot_dimension_numbers<[1], [0], [0], [1], [0, 0, 1, 1], [], []>} : vector<8x8xbf16>, vector<8x8xbf16>, vector<8x8xf32> -> vector<8x8xf32>
    %91 = vector.extract_strided_slice %35 {offsets = [0, 24], sizes = [8, 8], strides = [1, 1]} : vector<8x32xbf16> to vector<8x8xbf16>
    %92 = vector.extract_strided_slice %37 {offsets = [0, 24], sizes = [8, 8], strides = [1, 1]} : vector<8x32xbf16> to vector<8x8xbf16>
    %cst_36 = arith.constant dense<0.000000e+00> : vector<8x8xf32>
    %93 = tpu.matmul %91, %92, %cst_36 {dimension_numbers = #tpu.dot_dimension_numbers<[1], [1], [0], [0], [0, 0, 1, 0], [], []>} : vector<8x8xbf16>, vector<8x8xbf16>, vector<8x8xf32> -> vector<8x8xf32>
    %94 = arith.addf %93, %2 : vector<8x8xf32>
    %cst_37 = arith.constant dense<0xFF800000> : vector<8xf32>
    %95 = vector.multi_reduction <maximumf>, %94, %cst_37 [1] : vector<8x8xf32> to vector<8xf32>
    %96 = vector.shape_cast %95 : vector<8xf32> to vector<8x1xf32>
    %97 = vector.broadcast %96 : vector<8x1xf32> to vector<8x8xf32>
    %98 = arith.subf %94, %97 : vector<8x8xf32>
    %99 = math.exp %98 : vector<8x8xf32>
    %cst_38 = arith.constant dense<0.000000e+00> : vector<8xf32>
    %100 = vector.multi_reduction <add>, %99, %cst_38 [1] : vector<8x8xf32> to vector<8xf32>
    %101 = vector.shape_cast %100 : vector<8xf32> to vector<8x1xf32>
    %102 = tpu.reciprocal %101 {approx = true} : vector<8x1xf32> -> vector<8x1xf32>
    %103 = vector.broadcast %102 : vector<8x1xf32> to vector<8x8xf32>
    %104 = arith.mulf %99, %103 : vector<8x8xf32>
    %105 = arith.truncf %104 : vector<8x8xf32> to vector<8x8xbf16>
    %106 = vector.extract_strided_slice %39 {offsets = [0, 24], sizes = [8, 8], strides = [1, 1]} : vector<8x32xbf16> to vector<8x8xbf16>
    %cst_39 = arith.constant dense<0.000000e+00> : vector<8x8xf32>
    %107 = tpu.matmul %105, %106, %cst_39 {dimension_numbers = #tpu.dot_dimension_numbers<[1], [0], [0], [1], [0, 0, 1, 1], [], []>} : vector<8x8xbf16>, vector<8x8xbf16>, vector<8x8xf32> -> vector<8x8xf32>
    %108 = tpu.concatenate %56, %73, %90, %107 in 1 : vector<8x8xf32>, vector<8x8xf32>, vector<8x8xf32>, vector<8x8xf32> -> vector<8x32xf32>
    %109 = arith.truncf %108 : vector<8x32xf32> to vector<8x32xbf16>
    %cst_40 = arith.constant dense<0.000000e+00> : vector<8x32xf32>
    %110 = tpu.matmul %109, %31, %cst_40 {dimension_numbers = #tpu.dot_dimension_numbers<[1], [0], [0], [1], [0, 0, 1, 1], [], []>} : vector<8x32xbf16>, vector<32x32xbf16>, vector<8x32xf32> -> vector<8x32xf32>
    %111 = arith.addf %0, %110 : vector<8x32xf32>
    %112 = vector.broadcast %5 : vector<1x32xf32> to vector<8x32xf32>
    %113 = arith.addf %111, %112 : vector<8x32xf32>
    %cst_41 = arith.constant dense<0.000000e+00> : vector<8xf32>
    %114 = vector.multi_reduction <add>, %113, %cst_41 [1] : vector<8x32xf32> to vector<8xf32>
    %115 = vector.shape_cast %114 : vector<8xf32> to vector<8x1xf32>
    %cst_42 = arith.constant 3.200000e+01 : f32
    %116 = vector.broadcast %cst_42 : f32 to vector<8x1xf32>
    %117 = arith.divf %115, %116 : vector<8x1xf32>
    %118 = vector.broadcast %117 : vector<8x1xf32> to vector<8x32xf32>
    %119 = arith.subf %113, %118 : vector<8x32xf32>
    %120 = arith.mulf %119, %119 : vector<8x32xf32>
    %cst_43 = arith.constant dense<0.000000e+00> : vector<8xf32>
    %121 = vector.multi_reduction <add>, %120, %cst_43 [1] : vector<8x32xf32> to vector<8xf32>
    %122 = vector.shape_cast %121 : vector<8xf32> to vector<8x1xf32>
    %cst_44 = arith.constant 3.200000e+01 : f32
    %123 = vector.broadcast %cst_44 : f32 to vector<8x1xf32>
    %124 = arith.divf %122, %123 : vector<8x1xf32>
    %cst_45 = arith.constant 9.99999974E-6 : f32
    %125 = vector.broadcast %cst_45 : f32 to vector<8x1xf32>
    %126 = arith.addf %124, %125 : vector<8x1xf32>
    %127 = math.rsqrt %126 : vector<8x1xf32>
    %128 = vector.broadcast %127 : vector<8x1xf32> to vector<8x32xf32>
    %129 = arith.mulf %119, %128 : vector<8x32xf32>
    %130 = vector.broadcast %6 : vector<1x32xf32> to vector<8x32xf32>
    %131 = arith.mulf %129, %130 : vector<8x32xf32>
    %132 = vector.broadcast %7 : vector<1x32xf32> to vector<8x32xf32>
    %133 = arith.addf %131, %132 : vector<8x32xf32>
    %c32_46 = arith.constant 32 : index
    %c0_47 = arith.constant 0 : index
    %134 = vector.load %arg3[%c32_46, %c0_47] : memref<224x128xbf16, #tpu.memory_space<vmem>>, vector<32x64xbf16>
    %c32_48 = arith.constant 32 : index
    %c64_49 = arith.constant 64 : index
    %135 = vector.load %arg3[%c32_48, %c64_49] : memref<224x128xbf16, #tpu.memory_space<vmem>>, vector<64x32xbf16>
    %136 = arith.truncf %133 : vector<8x32xf32> to vector<8x32xbf16>
    %cst_50 = arith.constant dense<0.000000e+00> : vector<8x64xf32>
    %137 = tpu.matmul %136, %134, %cst_50 {dimension_numbers = #tpu.dot_dimension_numbers<[1], [0], [0], [1], [0, 0, 1, 1], [], []>} : vector<8x32xbf16>, vector<32x64xbf16>, vector<8x64xf32> -> vector<8x64xf32>
    %138 = vector.broadcast %8 : vector<1x64xf32> to vector<8x64xf32>
    %139 = arith.addf %137, %138 : vector<8x64xf32>
    %cst_51 = arith.constant 5.000000e-01 : f32
    %140 = vector.broadcast %cst_51 : f32 to vector<8x64xf32>
    %141 = arith.mulf %140, %139 : vector<8x64xf32>
    %cst_52 = arith.constant 1.41421354 : f32
    %142 = vector.broadcast %cst_52 : f32 to vector<8x64xf32>
    %143 = arith.divf %139, %142 : vector<8x64xf32>
    %144 = math.erf %143 : vector<8x64xf32>
    %cst_53 = arith.constant 1.000000e+00 : f32
    %145 = vector.broadcast %cst_53 : f32 to vector<8x64xf32>
    %146 = arith.addf %145, %144 : vector<8x64xf32>
    %147 = arith.mulf %141, %146 : vector<8x64xf32>
    %148 = arith.truncf %147 : vector<8x64xf32> to vector<8x64xbf16>
    %cst_54 = arith.constant dense<0.000000e+00> : vector<8x32xf32>
    %149 = tpu.matmul %148, %135, %cst_54 {dimension_numbers = #tpu.dot_dimension_numbers<[1], [0], [0], [1], [0, 0, 1, 1], [], []>} : vector<8x64xbf16>, vector<64x32xbf16>, vector<8x32xf32> -> vector<8x32xf32>
    %150 = arith.addf %113, %149 : vector<8x32xf32>
    %151 = vector.broadcast %9 : vector<1x32xf32> to vector<8x32xf32>
    %152 = arith.addf %150, %151 : vector<8x32xf32>
    %c2 = arith.constant 2 : index
    %c0_55 = arith.constant 0 : index
    %153 = vector.load %arg4[%c2, %c0_55] : memref<8x128xf32, #tpu.memory_space<vmem>>, vector<1x32xf32>
    %c2_56 = arith.constant 2 : index
    %c32_57 = arith.constant 32 : index
    %154 = vector.load %arg4[%c2_56, %c32_57] : memref<8x128xf32, #tpu.memory_space<vmem>>, vector<1x32xf32>
    %c2_58 = arith.constant 2 : index
    %c64_59 = arith.constant 64 : index
    %155 = vector.load %arg4[%c2_58, %c64_59] : memref<8x128xf32, #tpu.memory_space<vmem>>, vector<1x32xf32>
    %c2_60 = arith.constant 2 : index
    %c96_61 = arith.constant 96 : index
    %156 = vector.load %arg4[%c2_60, %c96_61] : memref<8x128xf32, #tpu.memory_space<vmem>>, vector<1x32xf32>
    %c3 = arith.constant 3 : index
    %c0_62 = arith.constant 0 : index
    %157 = vector.load %arg4[%c3, %c0_62] : memref<8x128xf32, #tpu.memory_space<vmem>>, vector<1x32xf32>
    %c3_63 = arith.constant 3 : index
    %c32_64 = arith.constant 32 : index
    %158 = vector.load %arg4[%c3_63, %c32_64] : memref<8x128xf32, #tpu.memory_space<vmem>>, vector<1x64xf32>
    %c3_65 = arith.constant 3 : index
    %c96_66 = arith.constant 96 : index
    %159 = vector.load %arg4[%c3_65, %c96_66] : memref<8x128xf32, #tpu.memory_space<vmem>>, vector<1x32xf32>
    %cst_67 = arith.constant dense<0.000000e+00> : vector<8xf32>
    %160 = vector.multi_reduction <add>, %152, %cst_67 [1] : vector<8x32xf32> to vector<8xf32>
    %161 = vector.shape_cast %160 : vector<8xf32> to vector<8x1xf32>
    %cst_68 = arith.constant 3.200000e+01 : f32
    %162 = vector.broadcast %cst_68 : f32 to vector<8x1xf32>
    %163 = arith.divf %161, %162 : vector<8x1xf32>
    %164 = vector.broadcast %163 : vector<8x1xf32> to vector<8x32xf32>
    %165 = arith.subf %152, %164 : vector<8x32xf32>
    %166 = arith.mulf %165, %165 : vector<8x32xf32>
    %cst_69 = arith.constant dense<0.000000e+00> : vector<8xf32>
    %167 = vector.multi_reduction <add>, %166, %cst_69 [1] : vector<8x32xf32> to vector<8xf32>
    %168 = vector.shape_cast %167 : vector<8xf32> to vector<8x1xf32>
    %cst_70 = arith.constant 3.200000e+01 : f32
    %169 = vector.broadcast %cst_70 : f32 to vector<8x1xf32>
    %170 = arith.divf %168, %169 : vector<8x1xf32>
    %cst_71 = arith.constant 9.99999974E-6 : f32
    %171 = vector.broadcast %cst_71 : f32 to vector<8x1xf32>
    %172 = arith.addf %170, %171 : vector<8x1xf32>
    %173 = math.rsqrt %172 : vector<8x1xf32>
    %174 = vector.broadcast %173 : vector<8x1xf32> to vector<8x32xf32>
    %175 = arith.mulf %165, %174 : vector<8x32xf32>
    %176 = vector.broadcast %153 : vector<1x32xf32> to vector<8x32xf32>
    %177 = arith.mulf %175, %176 : vector<8x32xf32>
    %178 = vector.broadcast %154 : vector<1x32xf32> to vector<8x32xf32>
    %179 = arith.addf %177, %178 : vector<8x32xf32>
    %c96_72 = arith.constant 96 : index
    %c0_73 = arith.constant 0 : index
    %180 = vector.load %arg3[%c96_72, %c0_73] : memref<224x128xbf16, #tpu.memory_space<vmem>>, vector<32x96xbf16>
    %c96_74 = arith.constant 96 : index
    %c96_75 = arith.constant 96 : index
    %181 = vector.load %arg3[%c96_74, %c96_75] : memref<224x128xbf16, #tpu.memory_space<vmem>>, vector<32x32xbf16>
    %182 = arith.truncf %179 : vector<8x32xf32> to vector<8x32xbf16>
    %cst_76 = arith.constant dense<0.000000e+00> : vector<8x96xf32>
    %183 = tpu.matmul %182, %180, %cst_76 {dimension_numbers = #tpu.dot_dimension_numbers<[1], [0], [0], [1], [0, 0, 1, 1], [], []>} : vector<8x32xbf16>, vector<32x96xbf16>, vector<8x96xf32> -> vector<8x96xf32>
    %184 = vector.extract_strided_slice %183 {offsets = [0, 0], sizes = [8, 32], strides = [1, 1]} : vector<8x96xf32> to vector<8x32xf32>
    %185 = arith.truncf %184 : vector<8x32xf32> to vector<8x32xbf16>
    %186 = vector.extract_strided_slice %183 {offsets = [0, 32], sizes = [8, 32], strides = [1, 1]} : vector<8x96xf32> to vector<8x32xf32>
    %187 = arith.truncf %186 : vector<8x32xf32> to vector<8x32xbf16>
    %188 = vector.extract_strided_slice %183 {offsets = [0, 64], sizes = [8, 32], strides = [1, 1]} : vector<8x96xf32> to vector<8x32xf32>
    %189 = arith.truncf %188 : vector<8x32xf32> to vector<8x32xbf16>
    %190 = vector.extract_strided_slice %185 {offsets = [0, 0], sizes = [8, 8], strides = [1, 1]} : vector<8x32xbf16> to vector<8x8xbf16>
    %191 = vector.extract_strided_slice %187 {offsets = [0, 0], sizes = [8, 8], strides = [1, 1]} : vector<8x32xbf16> to vector<8x8xbf16>
    %cst_77 = arith.constant dense<0.000000e+00> : vector<8x8xf32>
    %192 = tpu.matmul %190, %191, %cst_77 {dimension_numbers = #tpu.dot_dimension_numbers<[1], [1], [0], [0], [0, 0, 1, 0], [], []>} : vector<8x8xbf16>, vector<8x8xbf16>, vector<8x8xf32> -> vector<8x8xf32>
    %193 = arith.addf %192, %2 : vector<8x8xf32>
    %cst_78 = arith.constant dense<0xFF800000> : vector<8xf32>
    %194 = vector.multi_reduction <maximumf>, %193, %cst_78 [1] : vector<8x8xf32> to vector<8xf32>
    %195 = vector.shape_cast %194 : vector<8xf32> to vector<8x1xf32>
    %196 = vector.broadcast %195 : vector<8x1xf32> to vector<8x8xf32>
    %197 = arith.subf %193, %196 : vector<8x8xf32>
    %198 = math.exp %197 : vector<8x8xf32>
    %cst_79 = arith.constant dense<0.000000e+00> : vector<8xf32>
    %199 = vector.multi_reduction <add>, %198, %cst_79 [1] : vector<8x8xf32> to vector<8xf32>
    %200 = vector.shape_cast %199 : vector<8xf32> to vector<8x1xf32>
    %201 = tpu.reciprocal %200 {approx = true} : vector<8x1xf32> -> vector<8x1xf32>
    %202 = vector.broadcast %201 : vector<8x1xf32> to vector<8x8xf32>
    %203 = arith.mulf %198, %202 : vector<8x8xf32>
    %204 = arith.truncf %203 : vector<8x8xf32> to vector<8x8xbf16>
    %205 = vector.extract_strided_slice %189 {offsets = [0, 0], sizes = [8, 8], strides = [1, 1]} : vector<8x32xbf16> to vector<8x8xbf16>
    %cst_80 = arith.constant dense<0.000000e+00> : vector<8x8xf32>
    %206 = tpu.matmul %204, %205, %cst_80 {dimension_numbers = #tpu.dot_dimension_numbers<[1], [0], [0], [1], [0, 0, 1, 1], [], []>} : vector<8x8xbf16>, vector<8x8xbf16>, vector<8x8xf32> -> vector<8x8xf32>
    %207 = vector.extract_strided_slice %185 {offsets = [0, 8], sizes = [8, 8], strides = [1, 1]} : vector<8x32xbf16> to vector<8x8xbf16>
    %208 = vector.extract_strided_slice %187 {offsets = [0, 8], sizes = [8, 8], strides = [1, 1]} : vector<8x32xbf16> to vector<8x8xbf16>
    %cst_81 = arith.constant dense<0.000000e+00> : vector<8x8xf32>
    %209 = tpu.matmul %207, %208, %cst_81 {dimension_numbers = #tpu.dot_dimension_numbers<[1], [1], [0], [0], [0, 0, 1, 0], [], []>} : vector<8x8xbf16>, vector<8x8xbf16>, vector<8x8xf32> -> vector<8x8xf32>
    %210 = arith.addf %209, %2 : vector<8x8xf32>
    %cst_82 = arith.constant dense<0xFF800000> : vector<8xf32>
    %211 = vector.multi_reduction <maximumf>, %210, %cst_82 [1] : vector<8x8xf32> to vector<8xf32>
    %212 = vector.shape_cast %211 : vector<8xf32> to vector<8x1xf32>
    %213 = vector.broadcast %212 : vector<8x1xf32> to vector<8x8xf32>
    %214 = arith.subf %210, %213 : vector<8x8xf32>
    %215 = math.exp %214 : vector<8x8xf32>
    %cst_83 = arith.constant dense<0.000000e+00> : vector<8xf32>
    %216 = vector.multi_reduction <add>, %215, %cst_83 [1] : vector<8x8xf32> to vector<8xf32>
    %217 = vector.shape_cast %216 : vector<8xf32> to vector<8x1xf32>
    %218 = tpu.reciprocal %217 {approx = true} : vector<8x1xf32> -> vector<8x1xf32>
    %219 = vector.broadcast %218 : vector<8x1xf32> to vector<8x8xf32>
    %220 = arith.mulf %215, %219 : vector<8x8xf32>
    %221 = arith.truncf %220 : vector<8x8xf32> to vector<8x8xbf16>
    %222 = vector.extract_strided_slice %189 {offsets = [0, 8], sizes = [8, 8], strides = [1, 1]} : vector<8x32xbf16> to vector<8x8xbf16>
    %cst_84 = arith.constant dense<0.000000e+00> : vector<8x8xf32>
    %223 = tpu.matmul %221, %222, %cst_84 {dimension_numbers = #tpu.dot_dimension_numbers<[1], [0], [0], [1], [0, 0, 1, 1], [], []>} : vector<8x8xbf16>, vector<8x8xbf16>, vector<8x8xf32> -> vector<8x8xf32>
    %224 = vector.extract_strided_slice %185 {offsets = [0, 16], sizes = [8, 8], strides = [1, 1]} : vector<8x32xbf16> to vector<8x8xbf16>
    %225 = vector.extract_strided_slice %187 {offsets = [0, 16], sizes = [8, 8], strides = [1, 1]} : vector<8x32xbf16> to vector<8x8xbf16>
    %cst_85 = arith.constant dense<0.000000e+00> : vector<8x8xf32>
    %226 = tpu.matmul %224, %225, %cst_85 {dimension_numbers = #tpu.dot_dimension_numbers<[1], [1], [0], [0], [0, 0, 1, 0], [], []>} : vector<8x8xbf16>, vector<8x8xbf16>, vector<8x8xf32> -> vector<8x8xf32>
    %227 = arith.addf %226, %2 : vector<8x8xf32>
    %cst_86 = arith.constant dense<0xFF800000> : vector<8xf32>
    %228 = vector.multi_reduction <maximumf>, %227, %cst_86 [1] : vector<8x8xf32> to vector<8xf32>
    %229 = vector.shape_cast %228 : vector<8xf32> to vector<8x1xf32>
    %230 = vector.broadcast %229 : vector<8x1xf32> to vector<8x8xf32>
    %231 = arith.subf %227, %230 : vector<8x8xf32>
    %232 = math.exp %231 : vector<8x8xf32>
    %cst_87 = arith.constant dense<0.000000e+00> : vector<8xf32>
    %233 = vector.multi_reduction <add>, %232, %cst_87 [1] : vector<8x8xf32> to vector<8xf32>
    %234 = vector.shape_cast %233 : vector<8xf32> to vector<8x1xf32>
    %235 = tpu.reciprocal %234 {approx = true} : vector<8x1xf32> -> vector<8x1xf32>
    %236 = vector.broadcast %235 : vector<8x1xf32> to vector<8x8xf32>
    %237 = arith.mulf %232, %236 : vector<8x8xf32>
    %238 = arith.truncf %237 : vector<8x8xf32> to vector<8x8xbf16>
    %239 = vector.extract_strided_slice %189 {offsets = [0, 16], sizes = [8, 8], strides = [1, 1]} : vector<8x32xbf16> to vector<8x8xbf16>
    %cst_88 = arith.constant dense<0.000000e+00> : vector<8x8xf32>
    %240 = tpu.matmul %238, %239, %cst_88 {dimension_numbers = #tpu.dot_dimension_numbers<[1], [0], [0], [1], [0, 0, 1, 1], [], []>} : vector<8x8xbf16>, vector<8x8xbf16>, vector<8x8xf32> -> vector<8x8xf32>
    %241 = vector.extract_strided_slice %185 {offsets = [0, 24], sizes = [8, 8], strides = [1, 1]} : vector<8x32xbf16> to vector<8x8xbf16>
    %242 = vector.extract_strided_slice %187 {offsets = [0, 24], sizes = [8, 8], strides = [1, 1]} : vector<8x32xbf16> to vector<8x8xbf16>
    %cst_89 = arith.constant dense<0.000000e+00> : vector<8x8xf32>
    %243 = tpu.matmul %241, %242, %cst_89 {dimension_numbers = #tpu.dot_dimension_numbers<[1], [1], [0], [0], [0, 0, 1, 0], [], []>} : vector<8x8xbf16>, vector<8x8xbf16>, vector<8x8xf32> -> vector<8x8xf32>
    %244 = arith.addf %243, %2 : vector<8x8xf32>
    %cst_90 = arith.constant dense<0xFF800000> : vector<8xf32>
    %245 = vector.multi_reduction <maximumf>, %244, %cst_90 [1] : vector<8x8xf32> to vector<8xf32>
    %246 = vector.shape_cast %245 : vector<8xf32> to vector<8x1xf32>
    %247 = vector.broadcast %246 : vector<8x1xf32> to vector<8x8xf32>
    %248 = arith.subf %244, %247 : vector<8x8xf32>
    %249 = math.exp %248 : vector<8x8xf32>
    %cst_91 = arith.constant dense<0.000000e+00> : vector<8xf32>
    %250 = vector.multi_reduction <add>, %249, %cst_91 [1] : vector<8x8xf32> to vector<8xf32>
    %251 = vector.shape_cast %250 : vector<8xf32> to vector<8x1xf32>
    %252 = tpu.reciprocal %251 {approx = true} : vector<8x1xf32> -> vector<8x1xf32>
    %253 = vector.broadcast %252 : vector<8x1xf32> to vector<8x8xf32>
    %254 = arith.mulf %249, %253 : vector<8x8xf32>
    %255 = arith.truncf %254 : vector<8x8xf32> to vector<8x8xbf16>
    %256 = vector.extract_strided_slice %189 {offsets = [0, 24], sizes = [8, 8], strides = [1, 1]} : vector<8x32xbf16> to vector<8x8xbf16>
    %cst_92 = arith.constant dense<0.000000e+00> : vector<8x8xf32>
    %257 = tpu.matmul %255, %256, %cst_92 {dimension_numbers = #tpu.dot_dimension_numbers<[1], [0], [0], [1], [0, 0, 1, 1], [], []>} : vector<8x8xbf16>, vector<8x8xbf16>, vector<8x8xf32> -> vector<8x8xf32>
    %258 = tpu.concatenate %206, %223, %240, %257 in 1 : vector<8x8xf32>, vector<8x8xf32>, vector<8x8xf32>, vector<8x8xf32> -> vector<8x32xf32>
    %259 = arith.truncf %258 : vector<8x32xf32> to vector<8x32xbf16>
    %cst_93 = arith.constant dense<0.000000e+00> : vector<8x32xf32>
    %260 = tpu.matmul %259, %181, %cst_93 {dimension_numbers = #tpu.dot_dimension_numbers<[1], [0], [0], [1], [0, 0, 1, 1], [], []>} : vector<8x32xbf16>, vector<32x32xbf16>, vector<8x32xf32> -> vector<8x32xf32>
    %261 = arith.addf %152, %260 : vector<8x32xf32>
    %262 = vector.broadcast %155 : vector<1x32xf32> to vector<8x32xf32>
    %263 = arith.addf %261, %262 : vector<8x32xf32>
    %cst_94 = arith.constant dense<0.000000e+00> : vector<8xf32>
    %264 = vector.multi_reduction <add>, %263, %cst_94 [1] : vector<8x32xf32> to vector<8xf32>
    %265 = vector.shape_cast %264 : vector<8xf32> to vector<8x1xf32>
    %cst_95 = arith.constant 3.200000e+01 : f32
    %266 = vector.broadcast %cst_95 : f32 to vector<8x1xf32>
    %267 = arith.divf %265, %266 : vector<8x1xf32>
    %268 = vector.broadcast %267 : vector<8x1xf32> to vector<8x32xf32>
    %269 = arith.subf %263, %268 : vector<8x32xf32>
    %270 = arith.mulf %269, %269 : vector<8x32xf32>
    %cst_96 = arith.constant dense<0.000000e+00> : vector<8xf32>
    %271 = vector.multi_reduction <add>, %270, %cst_96 [1] : vector<8x32xf32> to vector<8xf32>
    %272 = vector.shape_cast %271 : vector<8xf32> to vector<8x1xf32>
    %cst_97 = arith.constant 3.200000e+01 : f32
    %273 = vector.broadcast %cst_97 : f32 to vector<8x1xf32>
    %274 = arith.divf %272, %273 : vector<8x1xf32>
    %cst_98 = arith.constant 9.99999974E-6 : f32
    %275 = vector.broadcast %cst_98 : f32 to vector<8x1xf32>
    %276 = arith.addf %274, %275 : vector<8x1xf32>
    %277 = math.rsqrt %276 : vector<8x1xf32>
    %278 = vector.broadcast %277 : vector<8x1xf32> to vector<8x32xf32>
    %279 = arith.mulf %269, %278 : vector<8x32xf32>
    %280 = vector.broadcast %156 : vector<1x32xf32> to vector<8x32xf32>
    %281 = arith.mulf %279, %280 : vector<8x32xf32>
    %282 = vector.broadcast %157 : vector<1x32xf32> to vector<8x32xf32>
    %283 = arith.addf %281, %282 : vector<8x32xf32>
    %c128 = arith.constant 128 : index
    %c0_99 = arith.constant 0 : index
    %284 = vector.load %arg3[%c128, %c0_99] : memref<224x128xbf16, #tpu.memory_space<vmem>>, vector<32x64xbf16>
    %c128_100 = arith.constant 128 : index
    %c64_101 = arith.constant 64 : index
    %285 = vector.load %arg3[%c128_100, %c64_101] : memref<224x128xbf16, #tpu.memory_space<vmem>>, vector<64x32xbf16>
    %286 = arith.truncf %283 : vector<8x32xf32> to vector<8x32xbf16>
    %cst_102 = arith.constant dense<0.000000e+00> : vector<8x64xf32>
    %287 = tpu.matmul %286, %284, %cst_102 {dimension_numbers = #tpu.dot_dimension_numbers<[1], [0], [0], [1], [0, 0, 1, 1], [], []>} : vector<8x32xbf16>, vector<32x64xbf16>, vector<8x64xf32> -> vector<8x64xf32>
    %288 = vector.broadcast %158 : vector<1x64xf32> to vector<8x64xf32>
    %289 = arith.addf %287, %288 : vector<8x64xf32>
    %cst_103 = arith.constant 5.000000e-01 : f32
    %290 = vector.broadcast %cst_103 : f32 to vector<8x64xf32>
    %291 = arith.mulf %290, %289 : vector<8x64xf32>
    %cst_104 = arith.constant 1.41421354 : f32
    %292 = vector.broadcast %cst_104 : f32 to vector<8x64xf32>
    %293 = arith.divf %289, %292 : vector<8x64xf32>
    %294 = math.erf %293 : vector<8x64xf32>
    %cst_105 = arith.constant 1.000000e+00 : f32
    %295 = vector.broadcast %cst_105 : f32 to vector<8x64xf32>
    %296 = arith.addf %295, %294 : vector<8x64xf32>
    %297 = arith.mulf %291, %296 : vector<8x64xf32>
    %298 = arith.truncf %297 : vector<8x64xf32> to vector<8x64xbf16>
    %cst_106 = arith.constant dense<0.000000e+00> : vector<8x32xf32>
    %299 = tpu.matmul %298, %285, %cst_106 {dimension_numbers = #tpu.dot_dimension_numbers<[1], [0], [0], [1], [0, 0, 1, 1], [], []>} : vector<8x64xbf16>, vector<64x32xbf16>, vector<8x32xf32> -> vector<8x32xf32>
    %300 = arith.addf %263, %299 : vector<8x32xf32>
    %301 = vector.broadcast %159 : vector<1x32xf32> to vector<8x32xf32>
    %302 = arith.addf %300, %301 : vector<8x32xf32>
    %c192 = arith.constant 192 : index
    %c0_107 = arith.constant 0 : index
    %303 = vector.load %arg3[%c192, %c0_107] : memref<224x128xbf16, #tpu.memory_space<vmem>>, vector<32x32xbf16>
    %c192_108 = arith.constant 192 : index
    %c32_109 = arith.constant 32 : index
    %304 = vector.load %arg3[%c192_108, %c32_109] : memref<224x128xbf16, #tpu.memory_space<vmem>>, vector<32x64xbf16>
    %c192_110 = arith.constant 192 : index
    %c96_111 = arith.constant 96 : index
    %305 = vector.load %arg3[%c192_110, %c96_111] : memref<224x128xbf16, #tpu.memory_space<vmem>>, vector<32x32xbf16>
    %c4 = arith.constant 4 : index
    %c0_112 = arith.constant 0 : index
    %306 = vector.load %arg4[%c4, %c0_112] : memref<8x128xf32, #tpu.memory_space<vmem>>, vector<1x32xf32>
    %c4_113 = arith.constant 4 : index
    %c32_114 = arith.constant 32 : index
    %307 = vector.load %arg4[%c4_113, %c32_114] : memref<8x128xf32, #tpu.memory_space<vmem>>, vector<1x64xf32>
    %c4_115 = arith.constant 4 : index
    %c96_116 = arith.constant 96 : index
    %308 = vector.load %arg4[%c4_115, %c96_116] : memref<8x128xf32, #tpu.memory_space<vmem>>, vector<1x32xf32>
    %309 = arith.truncf %302 : vector<8x32xf32> to vector<8x32xbf16>
    %cst_117 = arith.constant dense<0.000000e+00> : vector<8x32xf32>
    %310 = tpu.matmul %309, %303, %cst_117 {dimension_numbers = #tpu.dot_dimension_numbers<[1], [0], [0], [1], [0, 0, 1, 1], [], []>} : vector<8x32xbf16>, vector<32x32xbf16>, vector<8x32xf32> -> vector<8x32xf32>
    %311 = vector.broadcast %306 : vector<1x32xf32> to vector<8x32xf32>
    %312 = arith.addf %310, %311 : vector<8x32xf32>
    %cst_118 = arith.constant 0.000000e+00 : f32
    %313 = vector.broadcast %cst_118 : f32 to vector<8x32xf32>
    %314 = arith.maximumf %312, %313 : vector<8x32xf32>
    %315 = arith.truncf %314 : vector<8x32xf32> to vector<8x32xbf16>
    %cst_119 = arith.constant dense<0.000000e+00> : vector<8x64xf32>
    %316 = tpu.matmul %315, %304, %cst_119 {dimension_numbers = #tpu.dot_dimension_numbers<[1], [0], [0], [1], [0, 0, 1, 1], [], []>} : vector<8x32xbf16>, vector<32x64xbf16>, vector<8x64xf32> -> vector<8x64xf32>
    %317 = vector.broadcast %307 : vector<1x64xf32> to vector<8x64xf32>
    %318 = arith.addf %316, %317 : vector<8x64xf32>
    %319 = vector.extract_strided_slice %318 {offsets = [0, 0], sizes = [8, 32], strides = [1, 1]} : vector<8x64xf32> to vector<8x32xf32>
    %320 = vector.extract_strided_slice %318 {offsets = [0, 32], sizes = [8, 32], strides = [1, 1]} : vector<8x64xf32> to vector<8x32xf32>
    %cst_120 = arith.constant 5.000000e+00 : f32
    %321 = vector.broadcast %cst_120 : f32 to vector<8x32xf32>
    %322 = arith.subf %320, %321 : vector<8x32xf32>
    %cst_121 = arith.constant 2.000000e+01 : f32
    %323 = vector.broadcast %cst_121 : f32 to vector<8x32xf32>
    %324 = arith.minimumf %322, %323 : vector<8x32xf32>
    %cst_122 = arith.constant 2.000000e+01 : f32
    %325 = vector.broadcast %cst_122 : f32 to vector<8x32xf32>
    %326 = arith.cmpf ogt, %322, %325 : vector<8x32xf32>
    %327 = math.exp %324 : vector<8x32xf32>
    %328 = math.log1p %327 : vector<8x32xf32>
    %329 = arith.select %326, %322, %328 : vector<8x32xi1>, vector<8x32xf32>
    %330 = arith.mulf %1, %329 : vector<8x32xf32>
    %331 = arith.addf %319, %330 : vector<8x32xf32>
    %332 = arith.truncf %331 : vector<8x32xf32> to vector<8x32xbf16>
    %cst_123 = arith.constant dense<0.000000e+00> : vector<8x32xf32>
    %333 = tpu.matmul %332, %305, %cst_123 {dimension_numbers = #tpu.dot_dimension_numbers<[1], [0], [0], [1], [0, 0, 1, 1], [], []>} : vector<8x32xbf16>, vector<32x32xbf16>, vector<8x32xf32> -> vector<8x32xf32>
    %334 = vector.broadcast %308 : vector<1x32xf32> to vector<8x32xf32>
    %335 = arith.addf %333, %334 : vector<8x32xf32>
    %336 = tpu.concatenate %331, %335, %319, %329 in 1 : vector<8x32xf32>, vector<8x32xf32>, vector<8x32xf32>, vector<8x32xf32> -> vector<8x128xf32>
    %c0_124 = arith.constant 0 : index
    %c0_125 = arith.constant 0 : index
    %337 = vector.load %arg5[%c0_124, %c0_125] : memref<8x128xf32, #tpu.memory_space<vmem>>, vector<8x128xf32>
    tpu.vector_store %arg5[%c0_124, %c0_125], %336 {strides = array<i32>} : memref<8x128xf32, #tpu.memory_space<vmem>>, vector<8x128xf32>,
    return
  }
  func.func @transform_0(%arg0: i32) -> (i32, i32) {
    %c0_i32 = arith.constant 0 : i32
    %c0_i32_0 = arith.constant 0 : i32
    return %arg0, %c0_i32 : i32, i32
  }
  func.func @transform_1(%arg0: i32) -> (i32, i32) {
    %c0_i32 = arith.constant 0 : i32
    %c0_i32_0 = arith.constant 0 : i32
    %c0_i32_1 = arith.constant 0 : i32
    return %c0_i32, %c0_i32_0 : i32, i32
  }
  func.func @transform_2(%arg0: i32) -> (i32, i32) {
    %c0_i32 = arith.constant 0 : i32
    %c0_i32_0 = arith.constant 0 : i32
    %c0_i32_1 = arith.constant 0 : i32
    return %c0_i32, %c0_i32_0 : i32, i32
  }
  func.func @transform_3(%arg0: i32) -> (i32, i32) {
    %c0_i32 = arith.constant 0 : i32
    %c0_i32_0 = arith.constant 0 : i32
    %c0_i32_1 = arith.constant 0 : i32
    return %c0_i32, %c0_i32_0 : i32, i32
  }
  func.func @transform_4(%arg0: i32) -> (i32, i32) {
    %c0_i32 = arith.constant 0 : i32
    %c0_i32_0 = arith.constant 0 : i32
    return %arg0, %c0_i32 : i32, i32
  }
}

</mosaic_0001>

<bundles_post_ra>
// kernel: transformer_ib_forward.1
= control target key start
LH: loop header
LB: loop body
LE: loop exit
PB: predicated region body
PF: predicated region fallthrough
CT: control target
= control target key end

     0   :  { %s1618_s15 = smov 0   ;;  %s1939_s0 = inlined_call_operand.vmem [shape: f32[16,64], index: 0, kind: input, shape index: {}]   ;;  %s1940_s1 = inlined_call_operand.vmem [shape: f32[8,8], index: 1, kind: input, shape index: {}]   ;;  %s1941_s2 = inlined_call_operand.vmem [shape: bf16[224,128], index: 2, kind: input, shape index: {}]   ;;  %s1942_s3 = inlined_call_operand.vmem [shape: f32[8,128], index: 3, kind: input, shape index: {}]   ;;  %s1943_s4 = inlined_call_operand.vmem [shape: f32[16,128], index: 4, kind: output, shape index: {}]  }
   0x1 LB: > { %s1376_s16 = sadd.s32 4294967295, %s1574_s15   ;;  %p1380_p0 = scmp.ge.s32.totalorder %s1574_s15, 1  ;;  %s1574_s15 = sphi %s1618_s15, %s14_s15  }
   0x2   : > { %p161_p1 = scmp.lt.s32.totalorder %s1574_s15, 3 }
   0x4   : > { %p162_p2 = pnand %p1380_p0, %p161_p1 }
   0x5   : > { %p185_p3 = scmp.lt.s32.totalorder (!%p162_p2), %s1376_s16, 1  ;;  %s1577_s23 = smov (!%p162_p2), 96  }
   0x6   : > { %165 = sbr.rel (%p162_p2) target bundleno = 4490 (0x118a), region = 36  ;;  %s1578_s28 = smov (!%p162_p2), 72  }
   0x7   : > { %s1579_s29 = smov (!%p162_p2), 88   ;;  %s1580_s30 = smov (!%p162_p2), 120  }
   0x8   : > { %s1581_s5 = smov (!%p162_p2), 104   ;;  %s1582_s6 = smov (!%p162_p2), 80  }
   0x9   : > { %s1583_s7 = smov (!%p162_p2), 112   ;;  %s1584_s10 = smov (!%p162_p2), 64  }
   0xa   : > { %s1585_s11 = smov (!%p162_p2), 40   ;;  %s1586_s12 = smov (!%p162_p2), 56  }
   0xb   : > { %s1947_s16 = smov (!%p185_p3, %s1376_s16), 1  ;;  %vm198_vm0 = vcmask 261120   ;;  %v1576_v2 = vmov 32.0   ;;  %v1644_v3 = vld [vmem:[%s1942_s3] ss:$0 sm:$0xff]  ;;  %v1656_v15 = vld [vmem:[%s1941_s2 + $0x8] sm:$0xff] }
   0xc   : > { %s1944_s17 = sshll.u32 %s1947_s16, 3  ;;  %1515 = vrcp.f32 %v1576_v2  ;;  %231 = vrot.lane.b32.xlu1 %v1644_v3, %s1577_s23  ;;  %261 = vmatpush.bf16.msra.mxu0 %v1656_v15  ;;  %v1662_v16 = vld [vmem:[%s1941_s2] sm:$0xff]  ;;  %vm274_vm5 = vcmask 64512   ;;  %vm311_vm6 = vcmask 1043456   ;;  %s1587_s13 = smov 48   ;;  %vm509_vm7 = vcmask 130048  }
   0xd   : > { %s1634_s20 = scalar_lea.vmem %s1939_s0, %s1944_s17  ;;  %v1695_v48 = vld [vmem:[%s1940_s1] sm:$0xff]  ;;  %s1588_s14 = smov 32   ;;  %vm511_vm8 = vcmask 195584  }
   0xe   : > { %v1637_v0 = vld [vmem:[%s1634_s20] sm:$0xff]  ;;  %s1589_s18 = smov 8   ;;  %s1590_s19 = smov 16  }
   0xf   : > { %v199_v1 = vsel %vm198_vm0, %v1637_v0, 0.0  ;;  %s1591_s21 = smov 24  }
  0x10   : > { %200 = vadd.xlane.f32.xlu0 %v199_v1  ;;  %262 = vmatpush.bf16.msra.mxu0 %v1662_v16 }
  0x12   : > { %v1516_v4 = vpop.eup %1515 }
  0x13   : > { %v203_v5 = vmul.f32 32.0, %v1516_v4  ;;  %vm207_vm1 = vweird.f32 %v1516_v4 }
  0x15   : > { %v204_v6 = vsub.f32 1.0, %v203_v5 }
  0x17   : > { %v205_v7 = vmul.f32 %v1516_v4, %v204_v6 }
  0x19   : > { %v206_v8 = vadd.f32 %v1516_v4, %v205_v7 }
  0x1b   : > { %v1648_v9 = vsel %vm207_vm1, %v1516_v4, %v206_v8 }
  0x7e   : > { %v232_v28 = vpop.permute.xlu1 %231 }
  0x83   : > { %v201_v10 = vpop.xlane.xlu0 %200 }
  0x84   : > { %v209_v11 = vmul.f32 %v1648_v9, %v201_v10 }
  0x86   : > { %v210_v12 = vsub.f32 %v1637_v0, %v209_v11 }
  0x88   : > { %v211_v13 = vmul.f32 %v210_v12, %v210_v12 }
  0x8a   : > { %v212_v14 = vsel %vm198_vm0, %v211_v13, 0.0 }
  0x8b   : > { %213 = vadd.xlane.f32.xlu0 %v212_v14 }
  0xfe   : > { %v214_v17 = vpop.xlane.xlu0 %213 }
  0xff   : > { %v215_v18 = vmul.f32 %v214_v17, %v1648_v9 }
 0x101   : > { %v216_v19 = vadd.f32 1e-05, %v215_v18 }
 0x103   : > { %1517 = vrsqrt.f32 %v216_v19  ;;  %vm223_vm3 = vweird.f32 %v216_v19 }
 0x109   : > { %v1518_v20 = vpop.eup %1517 }
 0x10a   : > { %v218_v21 = vmul.f32 %v1518_v20, %v216_v19  ;;  %vm224_vm2 = vweird.f32 %v1518_v20 }
 0x10b   : > { %vm225_vm4 = vmor %vm223_vm3, %vm224_vm2  ;;  %vm684_vm2 = vcmask 523264  }
 0x10c   : > { %v219_v22 = vmul.f32 %v1518_v20, %v218_v21 }
 0x10e   : > { %v220_v23 = vmul.f32 0.5, %v219_v22 }
 0x110   : > { %v221_v24 = vsub.f32 1.5, %v220_v23 }
 0x112   : > { %v222_v25 = vmul.f32 %v1518_v20, %v221_v24 }
 0x114   : > { %v226_v26 = vsel %vm225_vm4, %v1518_v20, %v222_v25 }
 0x115   : > { %v227_v27 = vmul.f32 %v226_v26, %v210_v12 }
 0x117   : > { %v229_v29 = vmul.f32 %v1644_v3, %v227_v27 }
 0x119   : > { %v234_v30 = vadd.f32 %v232_v28, %v229_v29 }
 0x11b   : > { %v239_v31 = vpack.c.bf16 %v234_v30, %v234_v30 }
 0x11d   : > { %1391 = vmatmul.msk.bf16.vlgmr.msra.gmra.mxu0 %vm198_vm0, %v239_v31 }
 0x19a   : > { %v264_v32 = vpop.f32.mrf.mxu0 }
 0x19b   : > { %v268_v33 = vpack.c.bf16 %v264_v32, %v264_v32 }
 0x19d   : > { %v270_v34 = vunpack.c.l.b16 %v268_v33 }
 0x19f   : > { %v1668_v35 = vpack.c.b16 %v270_v34, %v270_v34 }
 0x1a1   : > { %442 = vrot.lane.b32.xlu0 %v1668_v35, %s1578_s28  ;;  %330 = vrot.lane.b32.xlu2 %v1668_v35, %s1579_s29 }
 0x1a2   : > { %272 = vrot.lane.b32.xlu1 %v1668_v35, %s1577_s23  ;;  %v266_v36 = vpop.f32.mrf.mxu0 }
 0x1a9   : > { %328 = vrot.lane.b32.xlu2 %v1668_v35, %s1580_s30 }
 0x1aa   : > { %440 = vrot.lane.b32.xlu1 %v1668_v35, %s1581_s5 }
 0x1b1   : > { %386 = vrot.lane.b32.xlu2 %v1668_v35, %s1582_s6 }
 0x1b2   : > { %384 = vrot.lane.b32.xlu1 %v1668_v35, %s1583_s7 }
 0x1fb   : > { %v331_v37 = vpop.permute.xlu2 %330 }
 0x1fc   : > { %v336_v38 = vsel %vm274_vm5, %v331_v37, 0 }
 0x1fd   : > { %345 = vmatpush.bf16.xpose.msra.mxu3 %v336_v38 }
 0x203   : > { %v329_v39 = vpop.permute.xlu2 %328 }
 0x204   : > { %1394 = vmatmul.msk.bf16.vlgmr.msra.gmra.mxu3 %vm274_vm5, %v329_v39 }
 0x20b   : > { %v387_v40 = vpop.permute.xlu2 %386 }
 0x20c   : > { %v392_v41 = vsel %vm274_vm5, %v387_v40, 0 }
 0x20d   : > { %401 = vmatpush.bf16.xpose.msrb.mxu0 %v392_v41 }
 0x213   : > { %v443_v42 = vpop.permute.xlu0 %442 }
 0x214   : > { %v273_v43 = vpop.permute.xlu1 %272  ;;  %v448_v44 = vsel %vm274_vm5, %v443_v42, 0 }
 0x215   : > { %v279_v45 = vsel %vm274_vm5, %v273_v43, 0  ;;  %457 = vmatpush.bf16.xpose.msrb.mxu3 %v448_v44 }
 0x216   : > { %288 = vmatpush.bf16.xpose.msra.mxu1 %v279_v45 }
 0x21c   : > { %v441_v46 = vpop.permute.xlu1 %440 }
 0x21d   : > { %1392 = vmatmul.msk.bf16.vlgmr.msra.gmra.mxu1 %vm274_vm5, %v268_v33  ;;  %1398 = vmatmul.msk.bf16.vlgmr.msrb.gmra.mxu3 %vm274_vm5, %v441_v46 }
 0x224   : > { %v385_v47 = vpop.permute.xlu1 %384 }
 0x225   : > { %1396 = vmatmul.msk.bf16.vlgmr.msrb.gmra.mxu0 %vm274_vm5, %v385_v47 }
 0x287   : > { %v347_v49 = vpop.f32.mrf.mxu3 }
 0x288   : > { %v348_v50 = vadd.f32 %v347_v49, %v1695_v48 }
 0x28a   : > { %v351_v51 = vsel %vm274_vm5, %v348_v50, -inf }
 0x28b   : > { %352 = vmax.xlane.f32.xlu1 %v351_v51 }
 0x28f   : > { %v349_v52 = vpop.f32.mrf.mxu3 }
 0x29a   : > { %v290_v53 = vpop.f32.mrf.mxu1 }
 0x29b   : > { %v291_v54 = vadd.f32 %v290_v53, %v1695_v48 }
 0x29d   : > { %v294_v55 = vsel %vm274_vm5, %v291_v54, -inf }
 0x29e   : > { %295 = vmax.xlane.f32.xlu2 %v294_v55 }
 0x2a0   : > { %v459_v56 = vpop.f32.mrf.mxu3 }
 0x2a1   : > { %v460_v57 = vadd.f32 %v459_v56, %v1695_v48 }
 0x2a2   : > { %v292_v58 = vpop.f32.mrf.mxu1  ;;  %v403_v59 = vpop.f32.mrf.mxu0 }
 0x2a3   : > { %v404_v60 = vadd.f32 %v403_v59, %v1695_v48  ;;  %v463_v61 = vsel %vm274_vm5, %v460_v57, -inf }
 0x2a4   : > { %464 = vmax.xlane.f32.xlu0 %v463_v61  ;;  %306 = vrot.lane.b32.xlu1 %v1668_v35, %s1584_s10 }
 0x2a5   : > { %v407_v62 = vsel %vm274_vm5, %v404_v60, -inf }
 0x2a6   : > { %408 = vmax.xlane.f32.xlu2 %v407_v62 }
 0x2a8   : > { %v461_v63 = vpop.f32.mrf.mxu3 }
 0x2aa   : > { %v405_v1 = vpop.f32.mrf.mxu0 }
 0x2ac   : > { %475 = vrot.lane.b32.xlu1 %v1668_v35, %s1585_s11 }
 0x2fe   : > { %v353_v2 = vpop.xlane.xlu1 %352 }
 0x2ff   : > { %v354_v13 = vsub.f32 %v348_v50, %v353_v2 }
 0x301   : > { %v355_v18 = vmul.f32 1.442695, %v354_v13 }
 0x311   : > { %v296_v4 = vpop.xlane.xlu2 %295 }
 0x312   : > { %v297_v5 = vsub.f32 %v291_v54, %v296_v4 }
 0x314   : > { %v298_v6 = vmul.f32 1.442695, %v297_v5 }
 0x316   : > { %1519 = vpow2.f32 %v298_v6  ;;  %v307_v7 = vpop.permute.xlu1 %306 }
 0x317   : > { %v313_v8 = vsel %vm311_vm6, %v307_v7, 0  ;;  %v465_v19 = vpop.xlane.xlu0 %464 }
 0x318   : > { %322 = vmatpush.bf16.msra.mxu2 %v313_v8  ;;  %v466_v21 = vsub.f32 %v460_v57, %v465_v19  ;;  %v1476_v19 = vld [vmem:[%s1941_s2 + $0x28] sm:$0xff] }
 0x319   : > { %v409_v10 = vpop.xlane.xlu2 %408 }
 0x31a   : > { %v410_v11 = vsub.f32 %v404_v60, %v409_v10  ;;  %v467_v23 = vmul.f32 1.442695, %v466_v21 }
 0x31c   : > { %v1520_v12 = vpop.eup %1519  ;;  %v411_v14 = vmul.f32 1.442695, %v410_v11 }
 0x31d   : > { %v300_v17 = vsel %vm274_vm5, %v1520_v12, 0.0 }
 0x31e   : > { %1521 = vpow2.f32 %v411_v14  ;;  %301 = vadd.xlane.f32.xlu2 %v300_v17  ;;  %v476_v33 = vpop.permute.xlu1 %475  ;;  %v1511_v17 = vld [vmem:[%s1942_s3 + $0x1] ss:$0 sm:$0xff] }
 0x31f   : > { %1523 = vpow2.f32 %v355_v18  ;;  %v481_v37 = vsel %vm311_vm6, %v476_v33, 0  ;;  %v1473_v18 = vld [vmem:[%s1941_s2 + $0x10] sm:$0xff] }
 0x320   : > { %1525 = vpow2.f32 %v467_v23  ;;  %v1475_v23 = vld [vmem:[%s1941_s2 + $0x20] sm:$0xff] }
 0x324   : > { %v1522_v20 = vpop.eup %1521 }
 0x325   : > { %v413_v22 = vsel %vm274_vm5, %v1522_v20, 0.0  ;;  %v1524_v24 = vpop.eup %1523 }
 0x326   : > { %414 = vadd.xlane.f32.xlu0 %v413_v22  ;;  %v357_v25 = vsel %vm274_vm5, %v1524_v24, 0.0  ;;  %v1526_v26 = vpop.eup %1525 }
 0x327   : > { %v469_v27 = vsel %vm274_vm5, %v1526_v26, 0.0 }
 0x32e   : > { %358 = vadd.xlane.f32.xlu0 %v357_v25 }
 0x336   : > { %363 = vrot.lane.b32.xlu2 %v1668_v35, %s1586_s12  ;;  %470 = vadd.xlane.f32.xlu0 %v469_v27 }
 0x33e   : > { %516 = vrot.lane.b32.xlu2 %v1656_v15, %s1588_s14 }
 0x34a   : > { %419 = vrot.lane.b32.xlu0 %v1668_v35, %s1587_s13 }
 0x352   : > { %537 = vrot.lane.b32.xlu0 %v1644_v3, %s1584_s10 }
 0x35a   : > { %563 = vrot.lane.b32.xlu0 %v1644_v3, %s1588_s14 }
 0x362   : > { %591 = vrot.lane.b32.xlu0 %v1511_v17, %s1577_s23 }
 0x36a   : > { %678 = vrot.lane.b32.xlu0 %v1476_v19, %s1584_s10 }
 0x372   : > { %676 = vrot.lane.b32.xlu0 %v1475_v23, %s1584_s10 }
 0x391   : > { %v302_v28 = vpop.xlane.xlu2 %301 }
 0x392   : > { %1527 = vrcp.f32 %v302_v28 }
 0x398   : > { %v1528_v29 = vpop.eup %1527 }
 0x399   : > { %v415_v30 = vpop.xlane.xlu0 %414  ;;  %v364_v31 = vpop.permute.xlu2 %363  ;;  %v304_v32 = vmul.f32 %v1528_v29, %v1520_v12 }
 0x39a   : > { %v369_v34 = vsel %vm311_vm6, %v364_v31, 0 }
 0x39b   : > { %378 = vmatpush.bf16.msrb.mxu2 %v369_v34  ;;  %v305_v36 = vpack.c.bf16 %v304_v32, %v304_v32 }
 0x39d   : > { %1393 = vmatmul.msk.bf16.vlgmr.msra.gmra.mxu2 %vm274_vm5, %v305_v36 }
 0x39f   : > { %490 = vmatpush.bf16.msra.mxu2 %v481_v37  ;;  %v1592_v37 = vmov 1.4142135  }
 0x3a1   : > { %v359_v35 = vpop.xlane.xlu0 %358  ;;  %v517_v15 = vpop.permute.xlu2 %516 }
 0x3a2   : > { %1529 = vrcp.f32 %v359_v35  ;;  %529 = vmatpush.bf16.msra.mxu0 %v517_v15 }
 0x3a8   : > { %v1530_v38 = vpop.eup %1529 }
 0x3a9   : > { %v361_v39 = vmul.f32 %v1530_v38, %v1524_v24  ;;  %v471_v40 = vpop.xlane.xlu0 %470 }
 0x3aa   : > { %1531 = vrcp.f32 %v471_v40 }
 0x3ab   : > { %v362_v41 = vpack.c.bf16 %v361_v39, %v361_v39  ;;  %1533 = vrcp.f32 %v415_v30 }
 0x3ad   : > { %1395 = vmatmul.msk.bf16.vlgmr.msrb.gmra.mxu2 %vm274_vm5, %v362_v41 }
 0x3b0   : > { %v1532_v42 = vpop.eup %1531 }
 0x3b1   : > { %v473_v43 = vmul.f32 %v1532_v42, %v1526_v26  ;;  %v1534_v44 = vpop.eup %1533 }
 0x3b2   : > { %v417_v45 = vmul.f32 %v1534_v44, %v1522_v20 }
 0x3b3   : > { %v474_v46 = vpack.c.bf16 %v473_v43, %v473_v43 }
 0x3b4   : > { %v418_v50 = vpack.c.bf16 %v417_v45, %v417_v45 }
 0x3bc   : > { %v420_v47 = vpop.permute.xlu0 %419 }
 0x3bd   : > { %1399 = vmatmul.msk.bf16.vlgmr.msra.gmra.mxu2 %vm274_vm5, %v474_v46  ;;  %v425_v49 = vsel %vm311_vm6, %v420_v47, 0 }
 0x3be   : > { %434 = vmatpush.bf16.msrb.mxu1 %v425_v49 }
 0x3c1   : > { %1397 = vmatmul.msk.bf16.vlgmr.msrb.gmra.mxu1 %vm274_vm5, %v418_v50 }
 0x3c4   : > { %v538_v5 = vpop.permute.xlu0 %537 }
 0x3cc   : > { %v564_v30 = vpop.permute.xlu0 %563 }
 0x3d4   : > { %v592_v41 = vpop.permute.xlu0 %591 }
 0x3dc   : > { %v679_v46 = vpop.permute.xlu0 %678 }
 0x3dd   : > { %692 = vmatpush.bf16.msra.mxu3 %v679_v46 }
 0x420   : > { %v324_v51 = vpop.f32.mrf.mxu2 }
 0x428   : > { %v326_v52 = vpop.f32.mrf.mxu2 }
 0x430   : > { %v380_v53 = vpop.f32.mrf.mxu2 }
 0x431   : > { %497 = vrot.lane.b32.xlu1 %v380_v53, %s1589_s18  ;;  %v677_v53 = vpop.permute.xlu0 %676 }
 0x432   : > { %693 = vmatpush.bf16.msra.mxu3 %v677_v53 }
 0x438   : > { %v382_v3 = vpop.f32.mrf.mxu2 }
 0x43e   : > { %v436_v54 = vpop.f32.mrf.mxu1 }
 0x43f   : > { %501 = vrot.lane.b32.xlu2 %v436_v54, %s1590_s19 }
 0x440   : > { %v492_v55 = vpop.f32.mrf.mxu2 }
 0x441   : > { %505 = vrot.lane.b32.xlu1 %v492_v55, %s1591_s21 }
 0x446   : > { %v438_v56 = vpop.f32.mrf.mxu1 }
 0x447   : > { %514 = vrot.lane.b32.xlu2 %v1662_v16, %s1588_s14 }
 0x448   : > { %v494_v57 = vpop.f32.mrf.mxu2 }
 0x499   : > { %v502_v58 = vpop.permute.xlu2 %501 }
 0x4a1   : > { %v515_v59 = vpop.permute.xlu2 %514 }
 0x4a2   : > { %530 = vmatpush.bf16.msra.mxu0 %v515_v59 }
 0x4a3   : > { %v498_v60 = vpop.permute.xlu1 %497 }
 0x4a4   : > { %v508_v61 = vsel %vm274_vm5, %v324_v51, %v498_v60 }
 0x4a5   : > { %v510_v63 = vsel %vm509_vm7, %v508_v61, %v502_v58 }
 0x4b3   : > { %v506_v62 = vpop.permute.xlu1 %505 }
 0x4b4   : > { %v512_v1 = vsel %vm511_vm8, %v510_v63, %v506_v62 }
 0x4b5   : > { %v513_v2 = vpack.c.bf16 %v512_v1, %v512_v1 }
 0x4b7   : > { %1400 = vmatmul.msk.bf16.vlgmr.msra.gmra.mxu0 %vm198_vm0, %v513_v2 }
 0x534   : > { %v532_v4 = vpop.f32.mrf.mxu0 }
 0x535   : > { %v536_v16 = vadd.f32 %v532_v4, %v1637_v0  ;;  %v1474_v0 = vld [vmem:[%s1941_s2 + $0x18] sm:$0xff] }
 0x536   : > { %603 = vmatpush.bf16.msra.mxu1 %v1474_v0  ;;  %674 = vrot.lane.b32.xlu0 %v1474_v0, %s1584_s10 }
 0x537   : > { %v1741_v6 = vadd.f32 %v538_v5, %v536_v16 }
 0x539   : > { %v541_v7 = vsel %vm198_vm0, %v1741_v6, 0.0 }
 0x53a   : > { %542 = vadd.xlane.f32.xlu1 %v541_v7  ;;  %604 = vmatpush.bf16.msra.mxu1 %v1473_v18 }
 0x53c   : > { %v534_v8 = vpop.f32.mrf.mxu0 }
 0x53e   : > { %702 = vrot.lane.b32.xlu0 %v1511_v17, %s1588_s14 }
 0x553   : > { %672 = vrot.lane.b32.xlu1 %v1473_v18, %s1584_s10 }
 0x5a8   : > { %v675_v60 = vpop.permute.xlu0 %674 }
 0x5a9   : > { %694 = vmatpush.bf16.msra.mxu3 %v675_v60 }
 0x5ad   : > { %v543_v10 = vpop.xlane.xlu1 %542 }
 0x5ae   : > { %v544_v11 = vmul.f32 %v543_v10, %v1648_v9 }
 0x5b0   : > { %v545_v12 = vsub.f32 %v1741_v6, %v544_v11 }
 0x5b2   : > { %v546_v13 = vmul.f32 %v545_v12, %v545_v12 }
 0x5b4   : > { %v547_v14 = vsel %vm198_vm0, %v546_v13, 0.0 }
 0x5b5   : > { %548 = vadd.xlane.f32.xlu2 %v547_v14 }
 0x5c5   : > { %v673_v1 = vpop.permute.xlu1 %672 }
 0x5c6   : > { %695 = vmatpush.bf16.msra.mxu3 %v673_v1 }
 0x628   : > { %v549_v20 = vpop.xlane.xlu2 %548 }
 0x629   : > { %v550_v21 = vmul.f32 %v549_v20, %v1648_v9 }
 0x62b   : > { %v551_v22 = vadd.f32 1e-05, %v550_v21 }
 0x62d   : > { %1535 = vrsqrt.f32 %v551_v22  ;;  %vm558_vm10 = vweird.f32 %v551_v22 }
 0x62e   : > { %1537 = vrcp.f32 %v1592_v37  ;;  %v1783_v37 = vld [vmem:[%s1942_s3 + $0x2] ss:$0 sm:$0xff] }
 0x633   : > { %v1536_v24 = vpop.eup %1535 }
 0x634   : > { %v553_v25 = vmul.f32 %v1536_v24, %v551_v22  ;;  %vm559_vm9 = vweird.f32 %v1536_v24  ;;  %v1538_v35 = vpop.eup %1537 }
 0x635   : > { %vm560_vm11 = vmor %vm558_vm10, %vm559_vm9  ;;  %v612_v38 = vmul.f32 1.4142135, %v1538_v35  ;;  %vm616_vm12 = vweird.f32 %v1538_v35 }
 0x636   : > { %v554_v26 = vmul.f32 %v1536_v24, %v553_v25 }
 0x637   : > { %v613_v39 = vsub.f32 1.0, %v612_v38 }
 0x638   : > { %v555_v27 = vmul.f32 0.5, %v554_v26 }
 0x639   : > { %v614_v40 = vmul.f32 %v1538_v35, %v613_v39 }
 0x63a   : > { %v556_v28 = vsub.f32 1.5, %v555_v27 }
 0x63b   : > { %v615_v42 = vadd.f32 %v1538_v35, %v614_v40 }
 0x63c   : > { %v557_v29 = vmul.f32 %v1536_v24, %v556_v28 }
 0x63d   : > { %v1771_v44 = vsel %vm616_vm12, %v1538_v35, %v615_v42  ;;  %v1799_v42 = vld [vmem:[%s1941_s2 + $0x30] sm:$0xff] }
 0x63e   : > { %v561_v31 = vsel %vm560_vm11, %v1536_v24, %v557_v29 }
 0x63f   : > { %v562_v32 = vmul.f32 %v561_v31, %v545_v12  ;;  %v703_v31 = vpop.permute.xlu0 %702 }
 0x641   : > { %v566_v33 = vmul.f32 %v564_v30, %v562_v32 }
 0x643   : > { %v568_v34 = vadd.f32 %v1511_v17, %v566_v33 }
 0x645   : > { %v577_v36 = vpack.c.bf16 %v568_v34, %v568_v34 }
 0x647   : > { %1409 = vmatmul.msk.bf16.vlgmr.msra.gmra.mxu1 %vm198_vm0, %v577_v36 }
 0x6c4   : > { %v606_v43 = vpop.f32.mrf.mxu1 }
 0x6c5   : > { %v607_v45 = vadd.f32 %v606_v43, %v592_v41  ;;  %v1793_v41 = vld [vmem:[%s1941_s2 + $0x38] sm:$0xff] }
 0x6c6   : > { %763 = vmatpush.bf16.msrb.mxu2 %v1793_v41 }
 0x6c7   : > { %v618_v47 = vmul.f32 %v1771_v44, %v607_v45  ;;  %v610_v26 = vmul.f32 0.5, %v607_v45 }
 0x6c9   : > { %v619_v49 = vmul.f32 %v618_v47, %v618_v47 }
 0x6ca   : > { %764 = vmatpush.bf16.msrb.mxu2 %v1799_v42 }
 0x6cb   : > { %v620_v50 = vmin.f32 %v619_v49, 16.0 }
 0x6cc   : > { %v608_v51 = vpop.f32.mrf.mxu1 }
 0x6cd   : > { %v621_v52 = vmul.f32 2.1237322e-06, %v620_v50  ;;  %v632_v15 = vmul.f32 3.8918573e-05, %v620_v50 }
 0x6cf   : > { %v622_v3 = vadd.f32 0.00028619796, %v621_v52  ;;  %v633_v54 = vadd.f32 0.001143296, %v632_v15 }
 0x6d1   : > { %v623_v55 = vmul.f32 %v622_v3, %v620_v50  ;;  %v634_v56 = vmul.f32 %v633_v54, %v620_v50 }
 0x6d3   : > { %v635_v57 = vadd.f32 0.014752088, %v634_v56  ;;  %v624_v58 = vadd.f32 0.0036580483, %v623_v55 }
 0x6d5   : > { %v636_v59 = vmul.f32 %v635_v57, %v620_v50  ;;  %v625_v62 = vmul.f32 %v624_v58, %v620_v50 }
 0x6d7   : > { %v637_v61 = vadd.f32 0.112945676, %v636_v59  ;;  %v626_v4 = vadd.f32 0.05243302, %v625_v62 }
 0x6d9   : > { %v638_v63 = vmul.f32 %v637_v61, %v620_v50  ;;  %v627_v7 = vmul.f32 %v626_v4, %v620_v50 }
 0x6db   : > { %v639_v2 = vadd.f32 0.4994258, %v638_v63  ;;  %v628_v8 = vadd.f32 0.18741608, %v627_v7 }
 0x6dd   : > { %v640_v5 = vmul.f32 %v639_v2, %v620_v50  ;;  %v629_v11 = vmul.f32 %v628_v8, %v620_v50 }
 0x6df   : > { %v641_v16 = vadd.f32 1.0, %v640_v5  ;;  %v630_v0 = vadd.f32 1.1283791, %v629_v11 }
 0x6e1   : > { %1539 = vrcp.f32 %v641_v16  ;;  %v653_v14 = vand.u32 2147483648, %v641_v16  ;;  %v651_v18 = vand.u32 2147483647, %v641_v16  ;;  %vm647_vm14 = vweird.f32 %v641_v16 }
 0x6e2   : > { %v631_v21 = vmul.f32 %v630_v0, %v618_v47 }
 0x6e3   : > { %v654_v20 = vor.u32 1.1754944e-38, %v653_v14  ;;  %vm652_vm1 = vcmp.eq.f32.partialorder %v651_v18, 8.507059e+37 }
 0x6e7   : > { %v1540_v10 = vpop.eup %1539 }
 0x6e8   : > { %v643_v12 = vmul.f32 %v1540_v10, %v641_v16  ;;  %vm648_vm13 = vweird.f32 %v1540_v10 }
 0x6e9   : > { %vm649_vm15 = vmor %vm647_vm14, %vm648_vm13 }
 0x6ea   : > { %v644_v13 = vsub.f32 1.0, %v643_v12 }
 0x6ec   : > { %v645_v17 = vmul.f32 %v1540_v10, %v644_v13 }
 0x6ee   : > { %v646_v19 = vadd.f32 %v1540_v10, %v645_v17 }
 0x6f0   : > { %v650_v22 = vsel %vm649_vm15, %v1540_v10, %v646_v19  ;;  %vm1320_vm15 = vcmask 785408  }
 0x6f1   : > { %v655_v23 = vsel %vm652_vm1, %v654_v20, %v650_v22 }
 0x6f2   : > { %v656_v24 = vmul.f32 %v655_v23, %v631_v21 }
 0x6f4   : > { %v1410_v25 = vclamps-f32 %v656_v24, 1.0 }
 0x6f6   : > { %v659_v27 = vadd.f32 1.0, %v1410_v25 }
 0x6f8   : > { %v660_v28 = vmul.f32 %v659_v27, %v610_v26 }
 0x6fa   : > { %v661_v29 = vpack.c.bf16 %v660_v28, %v660_v28 }
 0x6fc   : > { %1419 = vmatmul.msk.bf16.vlgmr.msra.gmra.mxu3 %vm684_vm2, %v661_v29 }
 0x77f   : > { %v697_v30 = vpop.f32.mrf.mxu3 }
 0x780   : > { %v701_v32 = vadd.f32 %v697_v30, %v1741_v6 }
 0x782   : > { %v1776_v33 = vadd.f32 %v703_v31, %v701_v32 }
 0x784   : > { %v708_v34 = vsel %vm198_vm0, %v1776_v33, 0.0 }
 0x785   : > { %709 = vadd.xlane.f32.xlu2 %v708_v34 }
 0x787   : > { %v699_v36 = vpop.f32.mrf.mxu3 }
 0x79d   : > { %733 = vrot.lane.b32.xlu2 %v1783_v37, %s1577_s23 }
 0x7f8   : > { %v710_v35 = vpop.xlane.xlu2 %709 }
 0x7f9   : > { %v711_v38 = vmul.f32 %v710_v35, %v1648_v9 }
 0x7fb   : > { %v712_v6 = vsub.f32 %v1776_v33, %v711_v38 }
 0x7fd   : > { %v713_v39 = vmul.f32 %v712_v6, %v712_v6 }
 0x7ff   : > { %v714_v40 = vsel %vm198_vm0, %v713_v39, 0.0 }
 0x800   : > { %715 = vadd.xlane.f32.xlu0 %v714_v40  ;;  %v734_v54 = vpop.permute.xlu2 %733 }
 0x873   : > { %v716_v43 = vpop.xlane.xlu0 %715 }
 0x874   : > { %v717_v45 = vmul.f32 %v716_v43, %v1648_v9 }
 0x876   : > { %v718_v46 = vadd.f32 1e-05, %v717_v45 }
 0x878   : > { %1541 = vrsqrt.f32 %v718_v46  ;;  %vm725_vm4 = vweird.f32 %v718_v46 }
 0x87e   : > { %v1542_v47 = vpop.eup %1541 }
 0x87f   : > { %v720_v49 = vmul.f32 %v1542_v47, %v718_v46  ;;  %vm726_vm3 = vweird.f32 %v1542_v47 }
 0x880   : > { %vm727_vm9 = vmor %vm725_vm4, %vm726_vm3 }
 0x881   : > { %v721_v50 = vmul.f32 %v1542_v47, %v720_v49 }
 0x883   : > { %v722_v51 = vmul.f32 0.5, %v721_v50 }
 0x885   : > { %v723_v52 = vsub.f32 1.5, %v722_v51 }
 0x887   : > { %v724_v15 = vmul.f32 %v1542_v47, %v723_v52 }
 0x889   : > { %v728_v53 = vsel %vm727_vm9, %v1542_v47, %v724_v15 }
 0x88a   : > { %v729_v3 = vmul.f32 %v728_v53, %v712_v6 }
 0x88c   : > { %v731_v55 = vmul.f32 %v1783_v37, %v729_v3 }
 0x88e   : > { %v736_v56 = vadd.f32 %v734_v54, %v731_v55 }
 0x890   : > { %v741_v57 = vpack.c.bf16 %v736_v56, %v736_v56 }
 0x892   : > { %1428 = vmatmul.msk.bf16.vlgmr.msrb.gmra.mxu2 %vm198_vm0, %v741_v57 }
 0x915   : > { %v766_v58 = vpop.f32.mrf.mxu2 }
 0x916   : > { %v770_v59 = vpack.c.bf16 %v766_v58, %v766_v58 }
 0x918   : > { %v772_v60 = vunpack.c.l.b16 %v770_v59 }
 0x91a   : > { %v1805_v61 = vpack.c.b16 %v772_v60, %v772_v60 }
 0x91c   : > { %774 = vrot.lane.b32.xlu2 %v1805_v61, %s1577_s23  ;;  %830 = vrot.lane.b32.xlu1 %v1805_v61, %s1579_s29 }
 0x91d   : > { %v768_v62 = vpop.f32.mrf.mxu2 }
 0x924   : > { %940 = vrot.lane.b32.xlu2 %v1805_v61, %s1581_s5  ;;  %828 = vrot.lane.b32.xlu1 %v1805_v61, %s1580_s30 }
 0x92c   : > { %884 = vrot.lane.b32.xlu2 %v1805_v61, %s1583_s7  ;;  %942 = vrot.lane.b32.xlu1 %v1805_v61, %s1578_s28 }
 0x934   : > { %886 = vrot.lane.b32.xlu1 %v1805_v61, %s1582_s6 }
 0x976   : > { %v775_v63 = vpop.permute.xlu2 %774 }
 0x977   : > { %v780_v1 = vsel %vm274_vm5, %v775_v63, 0 }
 0x978   : > { %789 = vmatpush.bf16.xpose.msrb.mxu0 %v780_v1 }
 0x97e   : > { %v941_v8 = vpop.permute.xlu2 %940 }
 0x97f   : > { %1429 = vmatmul.msk.bf16.vlgmr.msrb.gmra.mxu0 %vm274_vm5, %v770_v59 }
 0x986   : > { %v885_v12 = vpop.permute.xlu2 %884 }
 0x98e   : > { %v831_v2 = vpop.permute.xlu1 %830 }
 0x98f   : > { %v836_v4 = vsel %vm274_vm5, %v831_v2, 0 }
 0x990   : > { %845 = vmatpush.bf16.xpose.msrb.mxu3 %v836_v4 }
 0x996   : > { %v829_v5 = vpop.permute.xlu1 %828 }
 0x997   : > { %1431 = vmatmul.msk.bf16.vlgmr.msrb.gmra.mxu3 %vm274_vm5, %v829_v5 }
 0x99e   : > { %v943_v16 = vpop.permute.xlu1 %942 }
 0x99f   : > { %v948_v7 = vsel %vm274_vm5, %v943_v16, 0 }
 0x9a0   : > { %957 = vmatpush.bf16.xpose.msra.mxu3 %v948_v7 }
 0x9a6   : > { %v887_v10 = vpop.permute.xlu1 %886 }
 0x9a7   : > { %v892_v11 = vsel %vm274_vm5, %v887_v10, 0  ;;  %1435 = vmatmul.msk.bf16.vlgmr.msra.gmra.mxu3 %vm274_vm5, %v941_v8 }
 0x9a8   : > { %901 = vmatpush.bf16.xpose.msra.mxu0 %v892_v11 }
 0x9af   : > { %1433 = vmatmul.msk.bf16.vlgmr.msra.gmra.mxu0 %vm274_vm5, %v885_v12 }
 0x9fc   : > { %v791_v13 = vpop.f32.mrf.mxu0 }
 0x9fd   : > { %v792_v14 = vadd.f32 %v791_v13, %v1695_v48 }
 0x9ff   : > { %v795_v0 = vsel %vm274_vm5, %v792_v14, -inf }
 0xa00   : > { %796 = vmax.xlane.f32.xlu1 %v795_v0 }
 0xa04   : > { %v793_v17 = vpop.f32.mrf.mxu0 }
 0xa19   : > { %807 = vrot.lane.b32.xlu1 %v1805_v61, %s1584_s10 }
 0xa1a   : > { %v847_v18 = vpop.f32.mrf.mxu3 }
 0xa1b   : > { %v848_v19 = vadd.f32 %v847_v18, %v1695_v48 }
 0xa1d   : > { %v851_v20 = vsel %vm274_vm5, %v848_v19, -inf }
 0xa1e   : > { %852 = vmax.xlane.f32.xlu0 %v851_v20 }
 0xa21   : > { %919 = vrot.lane.b32.xlu1 %v1805_v61, %s1587_s13 }
 0xa22   : > { %v849_v21 = vpop.f32.mrf.mxu3 }
 0xa29   : > { %1014 = vrot.lane.b32.xlu1 %v1793_v41, %s1588_s14 }
 0xa2a   : > { %v959_v22 = vpop.f32.mrf.mxu3 }
 0xa2b   : > { %v960_v23 = vadd.f32 %v959_v22, %v1695_v48 }
 0xa2c   : > { %v903_v24 = vpop.f32.mrf.mxu0 }
 0xa2d   : > { %v904_v25 = vadd.f32 %v903_v24, %v1695_v48  ;;  %v963_v26 = vsel %vm274_vm5, %v960_v23, -inf }
 0xa2e   : > { %964 = vmax.xlane.f32.xlu2 %v963_v26 }
 0xa2f   : > { %v907_v27 = vsel %vm274_vm5, %v904_v25, -inf }
 0xa30   : > { %908 = vmax.xlane.f32.xlu0 %v907_v27 }
 0xa32   : > { %v961_v28 = vpop.f32.mrf.mxu3 }
 0xa34   : > { %v905_v29 = vpop.f32.mrf.mxu0 }
 0xa73   : > { %v797_v30 = vpop.xlane.xlu1 %796 }
 0xa74   : > { %v798_v31 = vsub.f32 %v792_v14, %v797_v30 }
 0xa76   : > { %v799_v32 = vmul.f32 1.442695, %v798_v31 }
 0xa78   : > { %1543 = vpow2.f32 %v799_v32 }
 0xa7e   : > { %v1544_v34 = vpop.eup %1543 }
 0xa7f   : > { %v801_v36 = vsel %vm274_vm5, %v1544_v34, 0.0 }
 0xa80   : > { %802 = vadd.xlane.f32.xlu0 %v801_v36 }
 0xa8b   : > { %v808_v35 = vpop.permute.xlu1 %807 }
 0xa8c   : > { %v813_v38 = vsel %vm311_vm6, %v808_v35, 0 }
 0xa8d   : > { %822 = vmatpush.bf16.msrb.mxu1 %v813_v38 }
 0xa91   : > { %v853_v48 = vpop.xlane.xlu0 %852 }
 0xa92   : > { %v854_v6 = vsub.f32 %v848_v19, %v853_v48 }
 0xa93   : > { %v920_v39 = vpop.permute.xlu1 %919 }
 0xa94   : > { %v855_v40 = vmul.f32 1.442695, %v854_v6  ;;  %v925_v41 = vsel %vm311_vm6, %v920_v39, 0 }
 0xa95   : > { %934 = vmatpush.bf16.msra.mxu1 %v925_v41  ;;  %v1480_v41 = vld [vmem:[%s1941_s2 + $0x48] sm:$0xff] }
 0xa96   : > { %1545 = vpow2.f32 %v855_v40 }
 0xa9b   : > { %v1015_v22 = vpop.permute.xlu1 %1014 }
 0xa9c   : > { %v1546_v43 = vpop.eup %1545  ;;  %1027 = vmatpush.bf16.msrb.mxu0 %v1015_v22 }
 0xa9d   : > { %v857_v45 = vsel %vm274_vm5, %v1546_v43, 0.0 }
 0xa9e   : > { %858 = vadd.xlane.f32.xlu0 %v857_v45  ;;  %v1482_v45 = vld [vmem:[%s1941_s2 + $0x58] sm:$0xff] }
 0xaa1   : > { %v965_v46 = vpop.xlane.xlu2 %964 }
 0xaa2   : > { %v966_v47 = vsub.f32 %v960_v23, %v965_v46  ;;  %v1481_v46 = vld [vmem:[%s1941_s2 + $0x50] sm:$0xff] }
 0xaa3   : > { %v909_v52 = vpop.xlane.xlu0 %908 }
 0xaa4   : > { %v967_v49 = vmul.f32 1.442695, %v966_v47  ;;  %v910_v15 = vsub.f32 %v904_v25, %v909_v52 }
 0xaa6   : > { %1547 = vpow2.f32 %v967_v49  ;;  %v911_v53 = vmul.f32 1.442695, %v910_v15 }
 0xaa8   : > { %1549 = vpow2.f32 %v911_v53 }
 0xaac   : > { %v1548_v50 = vpop.eup %1547 }
 0xaad   : > { %v969_v51 = vsel %vm274_vm5, %v1548_v50, 0.0 }
 0xaae   : > { %970 = vadd.xlane.f32.xlu2 %v969_v51  ;;  %v1550_v3 = vpop.eup %1549 }
 0xaaf   : > { %v913_v54 = vsel %vm274_vm5, %v1550_v3, 0.0 }
 0xab2   : > { %863 = vrot.lane.b32.xlu0 %v1805_v61, %s1586_s12 }
 0xac6   : > { %975 = vrot.lane.b32.xlu2 %v1805_v61, %s1585_s11 }
 0xadc   : > { %914 = vadd.xlane.f32.xlu0 %v913_v54 }
 0xaf0   : > { %1035 = vrot.lane.b32.xlu0 %v1783_v37, %s1584_s10 }
 0xaf3   : > { %v803_v55 = vpop.xlane.xlu0 %802 }
 0xaf4   : > { %1551 = vrcp.f32 %v803_v55 }
 0xaf8   : > { %1061 = vrot.lane.b32.xlu0 %v1783_v37, %s1588_s14 }
 0xafa   : > { %v1552_v56 = vpop.eup %1551 }
 0xafb   : > { %v805_v57 = vmul.f32 %v1552_v56, %v1544_v34 }
 0xafd   : > { %v806_v58 = vpack.c.bf16 %v805_v57, %v805_v57 }
 0xaff   : > { %1430 = vmatmul.msk.bf16.vlgmr.msrb.gmra.mxu1 %vm274_vm5, %v806_v58 }
 0xb00   : > { %1101 = vmatpush.bf16.msrb.mxu1 %v1480_v41 }
 0xb11   : > { %v859_v59 = vpop.xlane.xlu0 %858 }
 0xb12   : > { %1553 = vrcp.f32 %v859_v59 }
 0xb18   : > { %v1554_v60 = vpop.eup %1553 }
 0xb19   : > { %v861_v62 = vmul.f32 %v1554_v60, %v1546_v43  ;;  %v1479_v43 = vld [vmem:[%s1941_s2 + $0x40] sm:$0xff] }
 0xb1a   : > { %1102 = vmatpush.bf16.msrb.mxu1 %v1479_v43 }
 0xb1b   : > { %v862_v2 = vpack.c.bf16 %v861_v62, %v861_v62 }
 0xb21   : > { %v971_v61 = vpop.xlane.xlu2 %970 }
 0xb22   : > { %1555 = vrcp.f32 %v971_v61 }
 0xb24   : > { %v864_v63 = vpop.permute.xlu0 %863 }
 0xb25   : > { %v869_v1 = vsel %vm311_vm6, %v864_v63, 0 }
 0xb26   : > { %878 = vmatpush.bf16.msra.mxu2 %v869_v1 }
 0xb28   : > { %v1556_v5 = vpop.eup %1555 }
 0xb29   : > { %v976_v4 = vpop.permute.xlu2 %975  ;;  %1432 = vmatmul.msk.bf16.vlgmr.msra.gmra.mxu2 %vm274_vm5, %v862_v2  ;;  %v973_v16 = vmul.f32 %v1556_v5, %v1548_v50 }
 0xb2a   : > { %v981_v37 = vsel %vm311_vm6, %v976_v4, 0 }
 0xb2b   : > { %990 = vmatpush.bf16.msrb.mxu2 %v981_v37  ;;  %v974_v7 = vpack.c.bf16 %v973_v16, %v973_v16 }
 0xb39   : > { %1436 = vmatmul.msk.bf16.vlgmr.msrb.gmra.mxu2 %vm274_vm5, %v974_v7 }
 0xb4f   : > { %v915_v8 = vpop.xlane.xlu0 %914 }
 0xb50   : > { %1557 = vrcp.f32 %v915_v8 }
 0xb56   : > { %v1558_v10 = vpop.eup %1557 }
 0xb57   : > { %v917_v11 = vmul.f32 %v1558_v10, %v1550_v3 }
 0xb59   : > { %v918_v12 = vpack.c.bf16 %v917_v11, %v917_v11 }
 0xb5b   : > { %1434 = vmatmul.msk.bf16.vlgmr.msra.gmra.mxu1 %vm274_vm5, %v918_v12 }
 0xb62   : > { %v1036_v32 = vpop.permute.xlu0 %1035 }
 0xb7c   : > { %v824_v13 = vpop.f32.mrf.mxu1 }
 0xb84   : > { %v826_v14 = vpop.f32.mrf.mxu1 }
 0xbac   : > { %v880_v0 = vpop.f32.mrf.mxu2 }
 0xbad   : > { %997 = vrot.lane.b32.xlu2 %v880_v0, %s1589_s18 }
 0xbb4   : > { %v882_v17 = vpop.f32.mrf.mxu2 }
 0xbbc   : > { %v992_v18 = vpop.f32.mrf.mxu2 }
 0xbbd   : > { %1005 = vrot.lane.b32.xlu2 %v992_v18, %s1591_s21 }
 0xbc4   : > { %v994_v19 = vpop.f32.mrf.mxu2 }
 0xbd8   : > { %v936_v20 = vpop.f32.mrf.mxu1 }
 0xbd9   : > { %1001 = vrot.lane.b32.xlu1 %v936_v20, %s1590_s19 }
 0xbe0   : > { %v938_v21 = vpop.f32.mrf.mxu1 }
 0xbe1   : > { %1012 = vrot.lane.b32.xlu1 %v1799_v42, %s1588_s14 }
 0xc07   : > { %v998_v23 = vpop.permute.xlu2 %997 }
 0xc08   : > { %v1008_v25 = vsel %vm274_vm5, %v824_v13, %v998_v23 }
 0xc17   : > { %v1006_v27 = vpop.permute.xlu2 %1005 }
 0xc4b   : > { %v1002_v24 = vpop.permute.xlu1 %1001 }
 0xc4c   : > { %v1009_v26 = vsel %vm509_vm7, %v1008_v25, %v1002_v24 }
 0xc4d   : > { %v1010_v28 = vsel %vm511_vm8, %v1009_v26, %v1006_v27 }
 0xc4e   : > { %v1011_v30 = vpack.c.bf16 %v1010_v28, %v1010_v28 }
 0xc53   : > { %v1013_v29 = vpop.permute.xlu1 %1012 }
 0xc54   : > { %1028 = vmatpush.bf16.msrb.mxu0 %v1013_v29 }
 0xc57   : > { %1437 = vmatmul.msk.bf16.vlgmr.msrb.gmra.mxu0 %vm198_vm0, %v1011_v30 }
 0xcd4   : > { %v1030_v31 = vpop.f32.mrf.mxu0 }
 0xcd5   : > { %v1034_v42 = vadd.f32 %v1030_v31, %v1776_v33  ;;  %v1513_v33 = vld [vmem:[%s1942_s3 + $0x3] ss:$0 sm:$0xff] }
 0xcd6   : > { %1089 = vrot.lane.b32.xlu0 %v1513_v33, %s1577_s23 }
 0xcd7   : > { %v1873_v34 = vadd.f32 %v1036_v32, %v1034_v42 }
 0xcd9   : > { %v1039_v36 = vsel %vm198_vm0, %v1873_v34, 0.0 }
 0xcda   : > { %1040 = vadd.xlane.f32.xlu2 %v1039_v36 }
 0xcdc   : > { %v1032_v35 = vpop.f32.mrf.mxu0 }
 0xcde   : > { %1169 = vrot.lane.b32.xlu0 %v1482_v45, %s1584_s10 }
 0xce6   : > { %1165 = vrot.lane.b32.xlu0 %v1480_v41, %s1584_s10 }
 0xcee   : > { %1192 = vrot.lane.b32.xlu0 %v1513_v33, %s1588_s14 }
 0xcf2   : > { %1167 = vrot.lane.b32.xlu2 %v1481_v46, %s1584_s10 }
 0xd4d   : > { %v1041_v38 = vpop.xlane.xlu2 %1040 }
 0xd4e   : > { %v1042_v48 = vmul.f32 %v1041_v38, %v1648_v9 }
 0xd50   : > { %v1043_v6 = vsub.f32 %v1873_v34, %v1042_v48 }
 0xd52   : > { %v1044_v39 = vmul.f32 %v1043_v6, %v1043_v6 }
 0xd54   : > { %v1045_v40 = vsel %vm198_vm0, %v1044_v39, 0.0 }
 0xd55   : > { %1046 = vadd.xlane.f32.xlu1 %v1045_v40  ;;  %v1168_v12 = vpop.permute.xlu2 %1167 }
 0xd6e   : > { %1163 = vrot.lane.b32.xlu1 %v1479_v43, %s1584_s10 }
 0xdc8   : > { %v1047_v47 = vpop.xlane.xlu1 %1046 }
 0xdc9   : > { %v1048_v49 = vmul.f32 %v1047_v47, %v1648_v9  ;;  %v1062_v9 = vpop.permute.xlu0 %1061  ;;  %v1484_v47 = vld [vmem:[%s1941_s2 + $0x68] sm:$0xff] }
 0xdca   : > { %1224 = vmatpush.bf16.msra.mxu2 %v1484_v47  ;;  %1235 = vrot.lane.b32.xlu0 %v1484_v47, %s1577_s23 }
 0xdcb   : > { %v1049_v50 = vadd.f32 1e-05, %v1048_v49  ;;  %1283 = vrot.lane.b32.xlu1 %v1484_v47, %s1588_s14  ;;  %v1483_v49 = vld [vmem:[%s1941_s2 + $0x60] sm:$0xff] }
 0xdcc   : > { %1233 = vrot.lane.b32.xlu2 %v1483_v49, %s1577_s23 }
 0xdcd   : > { %1559 = vrsqrt.f32 %v1049_v50  ;;  %vm1056_vm6 = vweird.f32 %v1049_v50 }
 0xdce   : > { %1225 = vmatpush.bf16.msra.mxu2 %v1483_v49 }
 0xdd1   : > { %v1090_v60 = vpop.permute.xlu0 %1089 }
 0xdd3   : > { %v1560_v51 = vpop.eup %1559 }
 0xdd4   : > { %v1051_v52 = vmul.f32 %v1560_v51, %v1049_v50  ;;  %vm1057_vm5 = vweird.f32 %v1560_v51 }
 0xdd5   : > { %vm1058_vm7 = vmor %vm1056_vm6, %vm1057_vm5 }
 0xdd6   : > { %v1052_v15 = vmul.f32 %v1560_v51, %v1051_v52 }
 0xdd8   : > { %v1053_v53 = vmul.f32 0.5, %v1052_v15 }
 0xdd9   : > { %v1170_v16 = vpop.permute.xlu0 %1169 }
 0xdda   : > { %v1054_v3 = vsub.f32 1.5, %v1053_v53  ;;  %1182 = vmatpush.bf16.msrb.mxu3 %v1170_v16 }
 0xddc   : > { %v1055_v54 = vmul.f32 %v1560_v51, %v1054_v3 }
 0xdde   : > { %v1059_v55 = vsel %vm1058_vm7, %v1560_v51, %v1055_v54  ;;  %1183 = vmatpush.bf16.msrb.mxu3 %v1168_v12  ;;  %v1514_v54 = vld [vmem:[%s1942_s3 + $0x4] ss:$0 sm:$0xff] }
 0xddf   : > { %v1060_v56 = vmul.f32 %v1059_v55, %v1043_v6  ;;  %1240 = vrot.lane.b32.xlu0 %v1514_v54, %s1577_s23  ;;  %1287 = vrot.lane.b32.xlu1 %v1514_v54, %s1588_s14 }
 0xde0   : > { %v1164_v20 = vpop.permute.xlu1 %1163 }
 0xde1   : > { %v1064_v57 = vmul.f32 %v1062_v9, %v1060_v56  ;;  %v1166_v17 = vpop.permute.xlu0 %1165 }
 0xde2   : > { %1184 = vmatpush.bf16.msrb.mxu3 %v1166_v17 }
 0xde3   : > { %v1066_v58 = vadd.f32 %v1513_v33, %v1064_v57 }
 0xde5   : > { %v1075_v59 = vpack.c.bf16 %v1066_v58, %v1066_v58 }
 0xde6   : > { %1185 = vmatpush.bf16.msrb.mxu3 %v1164_v20 }
 0xde7   : > { %1446 = vmatmul.msk.bf16.vlgmr.msrb.gmra.mxu1 %vm198_vm0, %v1075_v59  ;;  %1281 = vrot.lane.b32.xlu0 %v1483_v49, %s1588_s14 }
 0xde9   : > { %v1193_v51 = vpop.permute.xlu0 %1192 }
 0xe26   : > { %v1234_v55 = vpop.permute.xlu2 %1233 }
 0xe3c   : > { %v1236_v9 = vpop.permute.xlu0 %1235 }
 0xe3d   : > { %1252 = vmatpush.bf16.msra.mxu0 %v1236_v9 }
 0xe41   : > { %1253 = vmatpush.bf16.msra.mxu0 %v1234_v55 }
 0xe64   : > { %v1104_v61 = vpop.f32.mrf.mxu1 }
 0xe65   : > { %v1105_v62 = vadd.f32 %v1104_v61, %v1090_v60  ;;  %v1241_v60 = vpop.permute.xlu0 %1240 }
 0xe67   : > { %v1109_v63 = vmul.f32 %v1105_v62, %v1771_v44  ;;  %v1108_v41 = vmul.f32 0.5, %v1105_v62 }
 0xe69   : > { %v1110_v1 = vmul.f32 %v1109_v63, %v1109_v63 }
 0xe6b   : > { %v1111_v2 = vmin.f32 %v1110_v1, 16.0 }
 0xe6c   : > { %v1106_v4 = vpop.f32.mrf.mxu1 }
 0xe6d   : > { %v1112_v37 = vmul.f32 2.1237322e-06, %v1111_v2  ;;  %v1123_v5 = vmul.f32 3.8918573e-05, %v1111_v2 }
 0xe6f   : > { %v1113_v7 = vadd.f32 0.00028619796, %v1112_v37  ;;  %v1124_v8 = vadd.f32 0.001143296, %v1123_v5 }
 0xe71   : > { %v1114_v10 = vmul.f32 %v1113_v7, %v1111_v2  ;;  %v1125_v11 = vmul.f32 %v1124_v8, %v1111_v2 }
 0xe73   : > { %v1126_v13 = vadd.f32 0.014752088, %v1125_v11  ;;  %v1115_v14 = vadd.f32 0.0036580483, %v1114_v10 }
 0xe75   : > { %v1127_v0 = vmul.f32 %v1126_v13, %v1111_v2  ;;  %v1116_v44 = vmul.f32 %v1115_v14, %v1111_v2 }
 0xe77   : > { %v1128_v18 = vadd.f32 0.112945676, %v1127_v0  ;;  %v1117_v22 = vadd.f32 0.05243302, %v1116_v44  ;;  %v1567_v0 = vld [vmem:[%s1634_s20] sm:$0xff]  ;;  %v1282_v44 = vpop.permute.xlu0 %1281  ;;  %s1945_s20 = sshll.u32 %s1947_s16, 3 }
 0xe78   : > { %s192_s26 = scalar_lea.vmem %s1943_s4, %s1945_s20 }
 0xe79   : > { %v1129_v19 = vmul.f32 %v1128_v18, %v1111_v2  ;;  %v1118_v25 = vmul.f32 %v1117_v22, %v1111_v2  ;;  %v1284_v18 = vpop.permute.xlu1 %1283 }
 0xe7a   : > { %1299 = vmatpush.bf16.msra.mxu1 %v1284_v18 }
 0xe7b   : > { %v1130_v21 = vadd.f32 0.4994258, %v1129_v19  ;;  %v1119_v26 = vadd.f32 0.18741608, %v1118_v25 }
 0xe7d   : > { %v1131_v23 = vmul.f32 %v1130_v21, %v1111_v2  ;;  %v1120_v28 = vmul.f32 %v1119_v26, %v1111_v2 }
 0xe7e   : > { %1300 = vmatpush.bf16.msra.mxu1 %v1282_v44 }
 0xe7f   : > { %v1132_v24 = vadd.f32 1.0, %v1131_v23  ;;  %v1121_v32 = vadd.f32 1.1283791, %v1120_v28 }
 0xe81   : > { %1561 = vrcp.f32 %v1132_v24  ;;  %v1144_v31 = vand.u32 2147483648, %v1132_v24  ;;  %v1142_v36 = vand.u32 2147483647, %v1132_v24  ;;  %vm1138_vm10 = vweird.f32 %v1132_v24  ;;  %v1288_v22 = vpop.permute.xlu1 %1287 }
 0xe82   : > { %v1122_v48 = vmul.f32 %v1121_v32, %v1109_v63 }
 0xe83   : > { %v1145_v38 = vor.u32 1.1754944e-38, %v1144_v31  ;;  %vm1143_vm12 = vcmp.eq.f32.partialorder %v1142_v36, 8.507059e+37 }
 0xe87   : > { %v1562_v27 = vpop.eup %1561 }
 0xe88   : > { %v1134_v29 = vmul.f32 %v1562_v27, %v1132_v24  ;;  %vm1139_vm8 = vweird.f32 %v1562_v27 }
 0xe89   : > { %vm1140_vm11 = vmor %vm1138_vm10, %vm1139_vm8 }
 0xe8a   : > { %v1135_v30 = vsub.f32 1.0, %v1134_v29 }
 0xe8c   : > { %v1136_v42 = vmul.f32 %v1562_v27, %v1135_v30 }
 0xe8e   : > { %v1137_v35 = vadd.f32 %v1562_v27, %v1136_v42 }
 0xe90   : > { %v1141_v6 = vsel %vm1140_vm11, %v1562_v27, %v1137_v35 }
 0xe91   : > { %v1146_v39 = vsel %vm1143_vm12, %v1145_v38, %v1141_v6 }
 0xe92   : > { %v1147_v40 = vmul.f32 %v1146_v39, %v1122_v48 }
 0xe94   : > { %v1447_v33 = vclamps-f32 %v1147_v40, 1.0 }
 0xe96   : > { %v1150_v43 = vadd.f32 1.0, %v1447_v33 }
 0xe98   : > { %v1151_v45 = vmul.f32 %v1150_v43, %v1108_v41 }
 0xe9a   : > { %v1152_v46 = vpack.c.bf16 %v1151_v45, %v1151_v45 }
 0xe9c   : > { %1456 = vmatmul.msk.bf16.vlgmr.msrb.gmra.mxu3 %vm684_vm2, %v1152_v46 }
 0xf1f   : > { %v1187_v50 = vpop.f32.mrf.mxu3 }
 0xf20   : > { %v1191_v52 = vadd.f32 %v1187_v50, %v1873_v34 }
 0xf22   : > { %v1195_v15 = vadd.f32 %v1193_v51, %v1191_v52 }
 0xf24   : > { %v1201_v53 = vpack.c.bf16 %v1195_v15, %v1195_v15 }
 0xf26   : > { %1465 = vmatmul.msk.bf16.vlgmr.msra.gmra.mxu2 %vm198_vm0, %v1201_v53 }
 0xf27   : > { %v1189_v3 = vpop.f32.mrf.mxu3 }
 0xfa9   : > { %v1227_v34 = vpop.f32.mrf.mxu2 }
 0xfaa   : > { %v1228_v56 = vadd.f32 %v1514_v54, %v1227_v34 }
 0xfac   : > { %v1231_v57 = vmax.f32 %v1228_v56, 0.0 }
 0xfae   : > { %v1232_v58 = vpack.c.bf16 %v1231_v57, %v1231_v57 }
 0xfb0   : > { %1466 = vmatmul.msk.bf16.vlgmr.msra.gmra.mxu0 %vm198_vm0, %v1232_v58 }
 0xfb1   : > { %v1229_v59 = vpop.f32.mrf.mxu2 }
0x102d   : > { %v1255_v61 = vpop.f32.mrf.mxu0 }
0x102e   : > { %v1256_v62 = vadd.f32 %v1255_v61, %v1241_v60 }
0x1030   : > { %v1467_v63 = vadd.f32 -5.0, %v1256_v62  ;;  %1311 = vrot.lane.b32.xlu0 %v1256_v62, %s1584_s10 }
0x1032   : > { %v1260_v1 = vmin.f32 %v1467_v63, 20.0  ;;  %vm1261_vm14 = vcmp.gt.f32.partialorder %v1467_v63, 20.0 }
0x1034   : > { %v1262_v2 = vmul.f32 1.442695, %v1260_v1 }
0x1035   : > { %v1257_v4 = vpop.f32.mrf.mxu0 }
0x1036   : > { %1563 = vpow2.f32 %v1262_v2 }
0x103c   : > { %v1564_v37 = vpop.eup %1563 }
0x103d   : > { %v1264_v5 = vadd.f32 1.0, %v1564_v37  ;;  %v1267_v16 = vmul.f32 -0.5, %v1564_v37  ;;  %v1270_v8 = vand.u32 2147483647, %v1564_v37 }
0x103f   : > { %1565 = vlog2.f32 %v1264_v5  ;;  %v1268_v7 = vadd.f32 1.0, %v1267_v16  ;;  %vm1271_vm13 = vcmp.lt.f32.partialorder %v1270_v8, 0.0004427343 }
0x1041   : > { %v1269_v12 = vmul.f32 %v1564_v37, %v1268_v7 }
0x1045   : > { %v1566_v10 = vpop.eup %1565 }
0x1046   : > { %v1266_v11 = vmul.f32 0.6931472, %v1566_v10 }
0x1048   : > { %v1272_v13 = vsel %vm1271_vm13, %v1269_v12, %v1266_v11 }
0x1049   : > { %v1273_v14 = vsel %vm1261_vm14, %v1467_v63, %v1272_v13 }
0x104a   : > { %1315 = vrot.lane.b32.xlu1 %v1273_v14, %s1584_s10  ;;  %v1274_v17 = vmul.f32 %v1567_v0, %v1273_v14 }
0x104c   : > { %1276 = vrot.lane.b32.xlu2 %v1274_v17, %s1577_s23 }
0x10a2   : > { %v1312_v27 = vpop.permute.xlu0 %1311 }
0x10a6   : > { %v1277_v19 = vpop.permute.xlu2 %1276 }
0x10a7   : > { %v1279_v20 = vadd.f32 %v1277_v19, %v1256_v62 }
0x10a9   : > { %v1280_v21 = vpack.c.bf16 %v1279_v20, %v1279_v20 }
0x10ab   : > { %1468 = vmatmul.msk.bf16.vlgmr.msra.gmra.mxu1 %vm198_vm0, %v1280_v21 }
0x10bc   : > { %v1316_v29 = vpop.permute.xlu1 %1315 }
0x1128   : > { %v1302_v23 = vpop.f32.mrf.mxu1 }
0x1129   : > { %v1303_v24 = vadd.f32 %v1302_v23, %v1288_v22 }
0x112b   : > { %1307 = vrot.lane.b32.xlu2 %v1303_v24, %s1588_s14 }
0x1130   : > { %v1304_v25 = vpop.f32.mrf.mxu1 }
0x1185   : > { %v1308_v26 = vpop.permute.xlu2 %1307 }
0x1186   : > { %v1318_v28 = vsel %vm198_vm0, %v1279_v20, %v1308_v26 }
0x1187   : > { %v1319_v30 = vsel %vm684_vm2, %v1318_v28, %v1312_v27 }
0x1188   : > { %v1321_v31 = vsel %vm1320_vm15, %v1319_v30, %v1316_v29 }
0x1189   : > { %1322 = vst [vmem:[%s192_s26] sm:$0xff] %v1321_v31 }
0x118a PF: > { %s14_s15 = sadd.s32 1, %s1574_s15  }
0x118b   : > { %p11_p4 = scmp.ge.s32.totalorder %s14_s15, 4  }
0x118d   :  { %13 = sbr.rel (!%p11_p4) target bundleno = 1 (0x1), region = 66 }

</bundles_post_ra>
